<compile_context>
chip_gen: v6e
topology: v6e:2x2x1
jax: 0.10.0
libtpu: 0.0.40
codegen_flags: <defaults>
</compile_context>

<pallas_src>
import functools
import math

import jax
import jax.numpy as jnp
from jax import lax
from jax.experimental import pallas as pl
from jax.experimental.pallas import tpu as pltpu


def encoder_block_kernel(x_ref, wq_ref, wk_ref, wo_ref, w1_ref, w2_ref,
                         vecs_ref, b1_ref, o_ref, qbf_ref, kbf_ref, *, heads):
    f32 = jnp.float32
    bf16 = jnp.bfloat16

    x = x_ref[0]                                   # (T, K) bf16
    T, K = x.shape
    H = heads
    dh = K // H
    scale = 1.0 / math.sqrt(dh)

    # Packed small vectors: [bq, bk, bo, g1, bn1, b2, g2, bn2] as rows of (8,K).
    bq = vecs_ref[0:1, :]
    bk = vecs_ref[1:2, :]
    bo = vecs_ref[2:3, :]
    g1 = vecs_ref[3:4, :]
    bn1 = vecs_ref[4:5, :]
    b2 = vecs_ref[5:6, :]
    g2 = vecs_ref[6:7, :]
    bn2 = vecs_ref[7:8, :]
    b1 = b1_ref[...]                               # (1, N)

    # ---- q / k projections: single full-width MXU matmuls -----------------
    q = jnp.dot(x, wq_ref[...], preferred_element_type=f32) + bq    # (T,K) f32
    k = jnp.dot(x, wk_ref[...], preferred_element_type=f32) + bk    # (T,K) f32
    # v intentionally reuses the key projection (PyTorch quirk: v = key_linear(x)).

    # bf16 copies staged in VMEM scratch; heads are read back as cheap static
    # lane slices (offset loads), no value reshapes / transposes.
    qbf_ref[...] = q.astype(bf16)
    kbf_ref[...] = k.astype(bf16)

    # ---- multi-head attention, head merge folded into output projection ---
    att = jnp.zeros((T, K), f32)
    for h in range(H):                             # static unroll, H small
        lo = h * dh
        qh = qbf_ref[:, lo:lo + dh]                # (T, dh) bf16
        kh = kbf_ref[:, lo:lo + dh]                # (T, dh) bf16  (also v_h)
        s = lax.dot_general(qh, kh, (((1,), (1,)), ((), ())),
                            preferred_element_type=f32) * scale     # (T, T)
        s = s - jnp.max(s, axis=-1, keepdims=True)
        p = jnp.exp(s)
        p = p * pl.reciprocal(jnp.sum(p, axis=-1, keepdims=True), approx=True)
        ah = jnp.dot(p.astype(bf16), kh, preferred_element_type=f32)  # (T, dh)
        # concat-of-heads @ wo  ==  sum_h  att_h @ wo[h*dh:(h+1)*dh, :]
        att = att + jnp.dot(ah.astype(bf16), wo_ref[lo:lo + dh, :],
                            preferred_element_type=f32)               # (T, K)
    att = att + bo

    # ---- residual + LayerNorm, ReLU FFN, residual + LayerNorm -------------
    def layer_norm(y, g, b):
        mu = jnp.mean(y, axis=-1, keepdims=True)
        var = jnp.mean((y - mu) ** 2, axis=-1, keepdims=True)
        return (y - mu) * lax.rsqrt(var + 1e-5) * g + b

    h1 = layer_norm(att + q, g1, bn1)                                 # (T,K) f32
    ff = jnp.dot(h1.astype(bf16), w1_ref[...],
                 preferred_element_type=f32) + b1                     # (T,N)
    ff = jnp.maximum(ff, 0.0)
    ff = jnp.dot(ff.astype(bf16), w2_ref[...],
                 preferred_element_type=f32) + b2                     # (T,K)
    out = layer_norm(ff + h1, g2, bn2)

    o_ref[0] = out.astype(o_ref.dtype)


def encoder_block(x, params, *, heads):
    """x: (B, T, K) float32. params: dict of weights (see init_params)."""
    B, T, K = x.shape
    assert K % heads == 0
    bf16 = jnp.bfloat16
    N = params["w1"].shape[1]

    # Host/XLA-side weight prep: bf16 weight casts + one packed f32 vector slab.
    wq = params["wq"].astype(bf16)                                   # (K, K)
    wk = params["wk"].astype(bf16)                                   # (K, K)
    wo = params["wo"].astype(bf16)                                   # (K, K)
    w1 = params["w1"].astype(bf16)                                   # (K, N)
    w2 = params["w2"].astype(bf16)                                   # (N, K)
    vecs = jnp.concatenate(
        [params["bq"], params["bk"], params["bo"],
         params["g1"], params["bn1"],
         params["b2"], params["g2"], params["bn2"]], axis=0)         # (8, K) f32
    b1 = params["b1"]                                                # (1, N) f32

    weights = [wq, wk, wo, w1, w2, vecs, b1]

    def wspec(arr):
        zeros = (0,) * arr.ndim
        # Grid-invariant: single-buffer to halve resident weight VMEM.
        return pl.BlockSpec(arr.shape, lambda b, _z=zeros: _z,
                            pipeline_mode=pl.Buffered(1))

    in_specs = [pl.BlockSpec((1, T, K), lambda b: (b, 0, 0))]
    in_specs += [wspec(a) for a in weights]
    out_spec = pl.BlockSpec((1, T, K), lambda b: (b, 0, 0))

    kernel = functools.partial(encoder_block_kernel, heads=heads)
    return pl.pallas_call(
        kernel,
        out_shape=jax.ShapeDtypeStruct((B, T, K), x.dtype),
        grid_spec=pltpu.PrefetchScalarGridSpec(
            num_scalar_prefetch=0,
            grid=(B,),
            in_specs=in_specs,
            out_specs=out_spec,
            scratch_shapes=[pltpu.VMEM((T, K), bf16),    # q (bf16 staging)
                            pltpu.VMEM((T, K), bf16)],   # k == v (bf16 staging)
        ),
        compiler_params=pltpu.CompilerParams(
            # Batch steps are independent.  TODO(synk): at production shapes add
            # a second "parallel" query-tile axis (flash tiling) so v7x's two
            # TensorCores both get work even when B is 1-2.
            dimension_semantics=("parallel",),
            # Safe across v5e/v6e/v7x; on v6e this can be raised toward ~96 MiB
            # to take bigger tiles at realistic sizes.
            vmem_limit_bytes=64 * 1024 * 1024,
        ),
    )(x.astype(bf16), *weights)


def init_params(key, n, k):
    """Deterministic synthetic parameters. Linear weights stored as (in, out)."""
    keys = jax.random.split(key, 8)
    s = 0.02
    return {
        "wq": s * jax.random.normal(keys[0], (k, k), jnp.float32),
        "bq": s * jax.random.normal(keys[1], (1, k), jnp.float32),
        "wk": s * jax.random.normal(keys[2], (k, k), jnp.float32),
        "bk": s * jax.random.normal(keys[3], (1, k), jnp.float32),
        "wo": s * jax.random.normal(keys[4], (k, k), jnp.float32),
        "bo": s * jax.random.normal(keys[5], (1, k), jnp.float32),
        "g1": jnp.ones((1, k), jnp.float32),
        "bn1": jnp.zeros((1, k), jnp.float32),
        "w1": s * jax.random.normal(keys[6], (k, n), jnp.float32),
        "b1": jnp.zeros((1, n), jnp.float32),
        "w2": s * jax.random.normal(keys[7], (n, k), jnp.float32),
        "b2": jnp.zeros((1, k), jnp.float32),
        "g2": jnp.ones((1, k), jnp.float32),
        "bn2": jnp.zeros((1, k), jnp.float32),
    }


def encoder_block_ref(x, p, *, heads):
    """Pure-JAX f32 reference for correctness checking."""
    B, T, K = x.shape
    dh = K // heads
    q = x @ p["wq"] + p["bq"]
    k = x @ p["wk"] + p["bk"]
    v = k                       # quirk: value uses key_linear
    qh = q.reshape(B, T, heads, dh).transpose(0, 2, 1, 3)
    kh = k.reshape(B, T, heads, dh).transpose(0, 2, 1, 3)
    vh = v.reshape(B, T, heads, dh).transpose(0, 2, 1, 3)
    s = jnp.einsum("bhqd,bhkd->bhqk", qh, kh) / math.sqrt(dh)
    pattn = jax.nn.softmax(s, axis=-1)
    att = jnp.einsum("bhqk,bhkd->bhqd", pattn, vh)
    att = att.transpose(0, 2, 1, 3).reshape(B, T, K)
    att = att @ p["wo"] + p["bo"]

    def ln(y, g, b):
        mu = y.mean(-1, keepdims=True)
        var = ((y - mu) ** 2).mean(-1, keepdims=True)
        return (y - mu) * lax.rsqrt(var + 1e-5) * g + b

    h1 = ln(att + q, p["g1"], p["bn1"])
    ff = jax.nn.relu(h1 @ p["w1"] + p["b1"]) @ p["w2"] + p["b2"]
    return ln(ff + h1, p["g2"], p["bn2"])


if __name__ == "__main__":
    # Tile-aligned small shapes: T=16 (bf16 sublane min), K=128 (lane-dense
    # output), N=256 (FFN hidden), 4 heads -> dh=32.
    B, T, K, HEADS, N = 2, 16, 128, 4, 256

    key = jax.random.PRNGKey(0)
    kx, kp = jax.random.split(key)
    x = jax.random.normal(kx, (B, T, K), jnp.float32)
    params = init_params(kp, N, K)

    out = encoder_block(x, params, heads=HEADS)
    out = jax.block_until_ready(out)

    ref = encoder_block_ref(x, params, heads=HEADS)
    assert out.shape == (B, T, K)
    # bf16 matmul operands (f32 accumulation) vs. an all-f32 reference.
    assert jnp.allclose(out, ref, atol=3e-2, rtol=3e-2)

    print("KERNEL_OK")
</pallas_src>

<mosaic_0001>
module attributes {stable_mosaic.version = 11 : i64} {
  func.func @encoder_block_kernel(%arg0: i32, %arg1: memref<1x16x128xbf16, #tpu.memory_space<vmem>>, %arg2: memref<128x128xbf16, #tpu.memory_space<vmem>>, %arg3: memref<128x128xbf16, #tpu.memory_space<vmem>>, %arg4: memref<128x128xbf16, #tpu.memory_space<vmem>>, %arg5: memref<128x256xbf16, #tpu.memory_space<vmem>>, %arg6: memref<256x128xbf16, #tpu.memory_space<vmem>>, %arg7: memref<8x128xf32, #tpu.memory_space<vmem>>, %arg8: memref<1x256xf32, #tpu.memory_space<vmem>>, %arg9: memref<1x16x128xf32, #tpu.memory_space<vmem>>, %arg10: memref<16x128xbf16, #tpu.memory_space<vmem>>, %arg11: memref<16x128xbf16, #tpu.memory_space<vmem>>) attributes {dimension_semantics = [#tpu.dimension_semantics<parallel>], iteration_bounds = array<i64: 2>, scalar_prefetch = 0 : i64, scratch_operands = 2 : i64, tpu.core_type = #tpu.core_type<tc>, window_params = [{transform_indices = @transform_0, window_bounds = array<i64: 1, 16, 128>}, {pipeline_mode = #tpu.pipeline_mode<synchronous>, transform_indices = @transform_1, window_bounds = array<i64: 128, 128>}, {pipeline_mode = #tpu.pipeline_mode<synchronous>, transform_indices = @transform_2, window_bounds = array<i64: 128, 128>}, {pipeline_mode = #tpu.pipeline_mode<synchronous>, transform_indices = @transform_3, window_bounds = array<i64: 128, 128>}, {pipeline_mode = #tpu.pipeline_mode<synchronous>, transform_indices = @transform_4, window_bounds = array<i64: 128, 256>}, {pipeline_mode = #tpu.pipeline_mode<synchronous>, transform_indices = @transform_5, window_bounds = array<i64: 256, 128>}, {pipeline_mode = #tpu.pipeline_mode<synchronous>, transform_indices = @transform_6, window_bounds = array<i64: 8, 128>}, {pipeline_mode = #tpu.pipeline_mode<synchronous>, transform_indices = @transform_7, window_bounds = array<i64: 1, 256>}, {transform_indices = @transform_8, window_bounds = array<i64: 1, 16, 128>}]} {
    %c0 = arith.constant 0 : index
    %c0_0 = arith.constant 0 : index
    %c0_1 = arith.constant 0 : index
    %0 = vector.load %arg1[%c0, %c0_0, %c0_1] : memref<1x16x128xbf16, #tpu.memory_space<vmem>>, vector<1x16x128xbf16>
    %1 = vector.shape_cast %0 : vector<1x16x128xbf16> to vector<16x128xbf16>
    %c0_2 = arith.constant 0 : index
    %c0_3 = arith.constant 0 : index
    %2 = vector.load %arg7[%c0_2, %c0_3] : memref<8x128xf32, #tpu.memory_space<vmem>>, vector<1x128xf32>
    %c1 = arith.constant 1 : index
    %c0_4 = arith.constant 0 : index
    %3 = vector.load %arg7[%c1, %c0_4] : memref<8x128xf32, #tpu.memory_space<vmem>>, vector<1x128xf32>
    %c2 = arith.constant 2 : index
    %c0_5 = arith.constant 0 : index
    %4 = vector.load %arg7[%c2, %c0_5] : memref<8x128xf32, #tpu.memory_space<vmem>>, vector<1x128xf32>
    %c3 = arith.constant 3 : index
    %c0_6 = arith.constant 0 : index
    %5 = vector.load %arg7[%c3, %c0_6] : memref<8x128xf32, #tpu.memory_space<vmem>>, vector<1x128xf32>
    %c4 = arith.constant 4 : index
    %c0_7 = arith.constant 0 : index
    %6 = vector.load %arg7[%c4, %c0_7] : memref<8x128xf32, #tpu.memory_space<vmem>>, vector<1x128xf32>
    %c5 = arith.constant 5 : index
    %c0_8 = arith.constant 0 : index
    %7 = vector.load %arg7[%c5, %c0_8] : memref<8x128xf32, #tpu.memory_space<vmem>>, vector<1x128xf32>
    %c6 = arith.constant 6 : index
    %c0_9 = arith.constant 0 : index
    %8 = vector.load %arg7[%c6, %c0_9] : memref<8x128xf32, #tpu.memory_space<vmem>>, vector<1x128xf32>
    %c7 = arith.constant 7 : index
    %c0_10 = arith.constant 0 : index
    %9 = vector.load %arg7[%c7, %c0_10] : memref<8x128xf32, #tpu.memory_space<vmem>>, vector<1x128xf32>
    %c0_11 = arith.constant 0 : index
    %c0_12 = arith.constant 0 : index
    %10 = vector.load %arg8[%c0_11, %c0_12] : memref<1x256xf32, #tpu.memory_space<vmem>>, vector<1x256xf32>
    %c0_13 = arith.constant 0 : index
    %c0_14 = arith.constant 0 : index
    %11 = vector.load %arg2[%c0_13, %c0_14] : memref<128x128xbf16, #tpu.memory_space<vmem>>, vector<128x128xbf16>
    %cst = arith.constant dense<0.000000e+00> : vector<16x128xf32>
    %12 = tpu.matmul %1, %11, %cst {dimension_numbers = #tpu.dot_dimension_numbers<[1], [0], [0], [1], [0, 0, 1, 1], [], []>} : vector<16x128xbf16>, vector<128x128xbf16>, vector<16x128xf32> -> vector<16x128xf32>
    %13 = vector.broadcast %2 : vector<1x128xf32> to vector<16x128xf32>
    %14 = arith.addf %12, %13 : vector<16x128xf32>
    %c0_15 = arith.constant 0 : index
    %c0_16 = arith.constant 0 : index
    %15 = vector.load %arg3[%c0_15, %c0_16] : memref<128x128xbf16, #tpu.memory_space<vmem>>, vector<128x128xbf16>
    %cst_17 = arith.constant dense<0.000000e+00> : vector<16x128xf32>
    %16 = tpu.matmul %1, %15, %cst_17 {dimension_numbers = #tpu.dot_dimension_numbers<[1], [0], [0], [1], [0, 0, 1, 1], [], []>} : vector<16x128xbf16>, vector<128x128xbf16>, vector<16x128xf32> -> vector<16x128xf32>
    %17 = vector.broadcast %3 : vector<1x128xf32> to vector<16x128xf32>
    %18 = arith.addf %16, %17 : vector<16x128xf32>
    %19 = arith.truncf %14 : vector<16x128xf32> to vector<16x128xbf16>
    %c0_18 = arith.constant 0 : index
    %c0_19 = arith.constant 0 : index
    %20 = vector.load %arg10[%c0_18, %c0_19] : memref<16x128xbf16, #tpu.memory_space<vmem>>, vector<16x128xbf16>
    tpu.vector_store %arg10[%c0_18, %c0_19], %19 {strides = array<i32>} : memref<16x128xbf16, #tpu.memory_space<vmem>>, vector<16x128xbf16>,
    %21 = arith.truncf %18 : vector<16x128xf32> to vector<16x128xbf16>
    %c0_20 = arith.constant 0 : index
    %c0_21 = arith.constant 0 : index
    %22 = vector.load %arg11[%c0_20, %c0_21] : memref<16x128xbf16, #tpu.memory_space<vmem>>, vector<16x128xbf16>
    tpu.vector_store %arg11[%c0_20, %c0_21], %21 {strides = array<i32>} : memref<16x128xbf16, #tpu.memory_space<vmem>>, vector<16x128xbf16>,
    %cst_22 = arith.constant 0.000000e+00 : f32
    %23 = vector.broadcast %cst_22 : f32 to vector<16x128xf32>
    %c0_23 = arith.constant 0 : index
    %c0_24 = arith.constant 0 : index
    %24 = vector.load %arg10[%c0_23, %c0_24] : memref<16x128xbf16, #tpu.memory_space<vmem>>, vector<16x32xbf16>
    %c0_25 = arith.constant 0 : index
    %c0_26 = arith.constant 0 : index
    %25 = vector.load %arg11[%c0_25, %c0_26] : memref<16x128xbf16, #tpu.memory_space<vmem>>, vector<16x32xbf16>
    %cst_27 = arith.constant dense<0.000000e+00> : vector<16x16xf32>
    %26 = tpu.matmul %24, %25, %cst_27 {dimension_numbers = #tpu.dot_dimension_numbers<[1], [1], [0], [0], [0, 0, 1, 0], [], []>} : vector<16x32xbf16>, vector<16x32xbf16>, vector<16x16xf32> -> vector<16x16xf32>
    %cst_28 = arith.constant 0.176776692 : f32
    %27 = vector.broadcast %cst_28 : f32 to vector<16x16xf32>
    %28 = arith.mulf %26, %27 : vector<16x16xf32>
    %cst_29 = arith.constant dense<0xFF800000> : vector<16xf32>
    %29 = vector.multi_reduction <maximumf>, %28, %cst_29 [1] : vector<16x16xf32> to vector<16xf32>
    %30 = vector.shape_cast %29 : vector<16xf32> to vector<16x1xf32>
    %31 = vector.broadcast %30 : vector<16x1xf32> to vector<16x16xf32>
    %32 = arith.subf %28, %31 : vector<16x16xf32>
    %33 = math.exp %32 : vector<16x16xf32>
    %cst_30 = arith.constant dense<0.000000e+00> : vector<16xf32>
    %34 = vector.multi_reduction <add>, %33, %cst_30 [1] : vector<16x16xf32> to vector<16xf32>
    %35 = vector.shape_cast %34 : vector<16xf32> to vector<16x1xf32>
    %36 = tpu.reciprocal %35 {approx = true} : vector<16x1xf32> -> vector<16x1xf32>
    %37 = vector.broadcast %36 : vector<16x1xf32> to vector<16x16xf32>
    %38 = arith.mulf %33, %37 : vector<16x16xf32>
    %39 = arith.truncf %38 : vector<16x16xf32> to vector<16x16xbf16>
    %cst_31 = arith.constant dense<0.000000e+00> : vector<16x32xf32>
    %40 = tpu.matmul %39, %25, %cst_31 {dimension_numbers = #tpu.dot_dimension_numbers<[1], [0], [0], [1], [0, 0, 1, 1], [], []>} : vector<16x16xbf16>, vector<16x32xbf16>, vector<16x32xf32> -> vector<16x32xf32>
    %41 = arith.truncf %40 : vector<16x32xf32> to vector<16x32xbf16>
    %c0_32 = arith.constant 0 : index
    %c0_33 = arith.constant 0 : index
    %42 = vector.load %arg4[%c0_32, %c0_33] : memref<128x128xbf16, #tpu.memory_space<vmem>>, vector<32x128xbf16>
    %cst_34 = arith.constant dense<0.000000e+00> : vector<16x128xf32>
    %43 = tpu.matmul %41, %42, %cst_34 {dimension_numbers = #tpu.dot_dimension_numbers<[1], [0], [0], [1], [0, 0, 1, 1], [], []>} : vector<16x32xbf16>, vector<32x128xbf16>, vector<16x128xf32> -> vector<16x128xf32>
    %44 = arith.addf %23, %43 : vector<16x128xf32>
    %c0_35 = arith.constant 0 : index
    %c32 = arith.constant 32 : index
    %45 = vector.load %arg10[%c0_35, %c32] : memref<16x128xbf16, #tpu.memory_space<vmem>>, vector<16x32xbf16>
    %c0_36 = arith.constant 0 : index
    %c32_37 = arith.constant 32 : index
    %46 = vector.load %arg11[%c0_36, %c32_37] : memref<16x128xbf16, #tpu.memory_space<vmem>>, vector<16x32xbf16>
    %cst_38 = arith.constant dense<0.000000e+00> : vector<16x16xf32>
    %47 = tpu.matmul %45, %46, %cst_38 {dimension_numbers = #tpu.dot_dimension_numbers<[1], [1], [0], [0], [0, 0, 1, 0], [], []>} : vector<16x32xbf16>, vector<16x32xbf16>, vector<16x16xf32> -> vector<16x16xf32>
    %cst_39 = arith.constant 0.176776692 : f32
    %48 = vector.broadcast %cst_39 : f32 to vector<16x16xf32>
    %49 = arith.mulf %47, %48 : vector<16x16xf32>
    %cst_40 = arith.constant dense<0xFF800000> : vector<16xf32>
    %50 = vector.multi_reduction <maximumf>, %49, %cst_40 [1] : vector<16x16xf32> to vector<16xf32>
    %51 = vector.shape_cast %50 : vector<16xf32> to vector<16x1xf32>
    %52 = vector.broadcast %51 : vector<16x1xf32> to vector<16x16xf32>
    %53 = arith.subf %49, %52 : vector<16x16xf32>
    %54 = math.exp %53 : vector<16x16xf32>
    %cst_41 = arith.constant dense<0.000000e+00> : vector<16xf32>
    %55 = vector.multi_reduction <add>, %54, %cst_41 [1] : vector<16x16xf32> to vector<16xf32>
    %56 = vector.shape_cast %55 : vector<16xf32> to vector<16x1xf32>
    %57 = tpu.reciprocal %56 {approx = true} : vector<16x1xf32> -> vector<16x1xf32>
    %58 = vector.broadcast %57 : vector<16x1xf32> to vector<16x16xf32>
    %59 = arith.mulf %54, %58 : vector<16x16xf32>
    %60 = arith.truncf %59 : vector<16x16xf32> to vector<16x16xbf16>
    %cst_42 = arith.constant dense<0.000000e+00> : vector<16x32xf32>
    %61 = tpu.matmul %60, %46, %cst_42 {dimension_numbers = #tpu.dot_dimension_numbers<[1], [0], [0], [1], [0, 0, 1, 1], [], []>} : vector<16x16xbf16>, vector<16x32xbf16>, vector<16x32xf32> -> vector<16x32xf32>
    %62 = arith.truncf %61 : vector<16x32xf32> to vector<16x32xbf16>
    %c32_43 = arith.constant 32 : index
    %c0_44 = arith.constant 0 : index
    %63 = vector.load %arg4[%c32_43, %c0_44] : memref<128x128xbf16, #tpu.memory_space<vmem>>, vector<32x128xbf16>
    %cst_45 = arith.constant dense<0.000000e+00> : vector<16x128xf32>
    %64 = tpu.matmul %62, %63, %cst_45 {dimension_numbers = #tpu.dot_dimension_numbers<[1], [0], [0], [1], [0, 0, 1, 1], [], []>} : vector<16x32xbf16>, vector<32x128xbf16>, vector<16x128xf32> -> vector<16x128xf32>
    %65 = arith.addf %44, %64 : vector<16x128xf32>
    %c0_46 = arith.constant 0 : index
    %c64 = arith.constant 64 : index
    %66 = vector.load %arg10[%c0_46, %c64] : memref<16x128xbf16, #tpu.memory_space<vmem>>, vector<16x32xbf16>
    %c0_47 = arith.constant 0 : index
    %c64_48 = arith.constant 64 : index
    %67 = vector.load %arg11[%c0_47, %c64_48] : memref<16x128xbf16, #tpu.memory_space<vmem>>, vector<16x32xbf16>
    %cst_49 = arith.constant dense<0.000000e+00> : vector<16x16xf32>
    %68 = tpu.matmul %66, %67, %cst_49 {dimension_numbers = #tpu.dot_dimension_numbers<[1], [1], [0], [0], [0, 0, 1, 0], [], []>} : vector<16x32xbf16>, vector<16x32xbf16>, vector<16x16xf32> -> vector<16x16xf32>
    %cst_50 = arith.constant 0.176776692 : f32
    %69 = vector.broadcast %cst_50 : f32 to vector<16x16xf32>
    %70 = arith.mulf %68, %69 : vector<16x16xf32>
    %cst_51 = arith.constant dense<0xFF800000> : vector<16xf32>
    %71 = vector.multi_reduction <maximumf>, %70, %cst_51 [1] : vector<16x16xf32> to vector<16xf32>
    %72 = vector.shape_cast %71 : vector<16xf32> to vector<16x1xf32>
    %73 = vector.broadcast %72 : vector<16x1xf32> to vector<16x16xf32>
    %74 = arith.subf %70, %73 : vector<16x16xf32>
    %75 = math.exp %74 : vector<16x16xf32>
    %cst_52 = arith.constant dense<0.000000e+00> : vector<16xf32>
    %76 = vector.multi_reduction <add>, %75, %cst_52 [1] : vector<16x16xf32> to vector<16xf32>
    %77 = vector.shape_cast %76 : vector<16xf32> to vector<16x1xf32>
    %78 = tpu.reciprocal %77 {approx = true} : vector<16x1xf32> -> vector<16x1xf32>
    %79 = vector.broadcast %78 : vector<16x1xf32> to vector<16x16xf32>
    %80 = arith.mulf %75, %79 : vector<16x16xf32>
    %81 = arith.truncf %80 : vector<16x16xf32> to vector<16x16xbf16>
    %cst_53 = arith.constant dense<0.000000e+00> : vector<16x32xf32>
    %82 = tpu.matmul %81, %67, %cst_53 {dimension_numbers = #tpu.dot_dimension_numbers<[1], [0], [0], [1], [0, 0, 1, 1], [], []>} : vector<16x16xbf16>, vector<16x32xbf16>, vector<16x32xf32> -> vector<16x32xf32>
    %83 = arith.truncf %82 : vector<16x32xf32> to vector<16x32xbf16>
    %c64_54 = arith.constant 64 : index
    %c0_55 = arith.constant 0 : index
    %84 = vector.load %arg4[%c64_54, %c0_55] : memref<128x128xbf16, #tpu.memory_space<vmem>>, vector<32x128xbf16>
    %cst_56 = arith.constant dense<0.000000e+00> : vector<16x128xf32>
    %85 = tpu.matmul %83, %84, %cst_56 {dimension_numbers = #tpu.dot_dimension_numbers<[1], [0], [0], [1], [0, 0, 1, 1], [], []>} : vector<16x32xbf16>, vector<32x128xbf16>, vector<16x128xf32> -> vector<16x128xf32>
    %86 = arith.addf %65, %85 : vector<16x128xf32>
    %c0_57 = arith.constant 0 : index
    %c96 = arith.constant 96 : index
    %87 = vector.load %arg10[%c0_57, %c96] : memref<16x128xbf16, #tpu.memory_space<vmem>>, vector<16x32xbf16>
    %c0_58 = arith.constant 0 : index
    %c96_59 = arith.constant 96 : index
    %88 = vector.load %arg11[%c0_58, %c96_59] : memref<16x128xbf16, #tpu.memory_space<vmem>>, vector<16x32xbf16>
    %cst_60 = arith.constant dense<0.000000e+00> : vector<16x16xf32>
    %89 = tpu.matmul %87, %88, %cst_60 {dimension_numbers = #tpu.dot_dimension_numbers<[1], [1], [0], [0], [0, 0, 1, 0], [], []>} : vector<16x32xbf16>, vector<16x32xbf16>, vector<16x16xf32> -> vector<16x16xf32>
    %cst_61 = arith.constant 0.176776692 : f32
    %90 = vector.broadcast %cst_61 : f32 to vector<16x16xf32>
    %91 = arith.mulf %89, %90 : vector<16x16xf32>
    %cst_62 = arith.constant dense<0xFF800000> : vector<16xf32>
    %92 = vector.multi_reduction <maximumf>, %91, %cst_62 [1] : vector<16x16xf32> to vector<16xf32>
    %93 = vector.shape_cast %92 : vector<16xf32> to vector<16x1xf32>
    %94 = vector.broadcast %93 : vector<16x1xf32> to vector<16x16xf32>
    %95 = arith.subf %91, %94 : vector<16x16xf32>
    %96 = math.exp %95 : vector<16x16xf32>
    %cst_63 = arith.constant dense<0.000000e+00> : vector<16xf32>
    %97 = vector.multi_reduction <add>, %96, %cst_63 [1] : vector<16x16xf32> to vector<16xf32>
    %98 = vector.shape_cast %97 : vector<16xf32> to vector<16x1xf32>
    %99 = tpu.reciprocal %98 {approx = true} : vector<16x1xf32> -> vector<16x1xf32>
    %100 = vector.broadcast %99 : vector<16x1xf32> to vector<16x16xf32>
    %101 = arith.mulf %96, %100 : vector<16x16xf32>
    %102 = arith.truncf %101 : vector<16x16xf32> to vector<16x16xbf16>
    %cst_64 = arith.constant dense<0.000000e+00> : vector<16x32xf32>
    %103 = tpu.matmul %102, %88, %cst_64 {dimension_numbers = #tpu.dot_dimension_numbers<[1], [0], [0], [1], [0, 0, 1, 1], [], []>} : vector<16x16xbf16>, vector<16x32xbf16>, vector<16x32xf32> -> vector<16x32xf32>
    %104 = arith.truncf %103 : vector<16x32xf32> to vector<16x32xbf16>
    %c96_65 = arith.constant 96 : index
    %c0_66 = arith.constant 0 : index
    %105 = vector.load %arg4[%c96_65, %c0_66] : memref<128x128xbf16, #tpu.memory_space<vmem>>, vector<32x128xbf16>
    %cst_67 = arith.constant dense<0.000000e+00> : vector<16x128xf32>
    %106 = tpu.matmul %104, %105, %cst_67 {dimension_numbers = #tpu.dot_dimension_numbers<[1], [0], [0], [1], [0, 0, 1, 1], [], []>} : vector<16x32xbf16>, vector<32x128xbf16>, vector<16x128xf32> -> vector<16x128xf32>
    %107 = arith.addf %86, %106 : vector<16x128xf32>
    %108 = vector.broadcast %4 : vector<1x128xf32> to vector<16x128xf32>
    %109 = arith.addf %107, %108 : vector<16x128xf32>
    %110 = arith.addf %109, %14 : vector<16x128xf32>
    %cst_68 = arith.constant dense<0.000000e+00> : vector<16xf32>
    %111 = vector.multi_reduction <add>, %110, %cst_68 [1] : vector<16x128xf32> to vector<16xf32>
    %112 = vector.shape_cast %111 : vector<16xf32> to vector<16x1xf32>
    %cst_69 = arith.constant 1.280000e+02 : f32
    %113 = vector.broadcast %cst_69 : f32 to vector<16x1xf32>
    %114 = arith.divf %112, %113 : vector<16x1xf32>
    %115 = vector.broadcast %114 : vector<16x1xf32> to vector<16x128xf32>
    %116 = arith.subf %110, %115 : vector<16x128xf32>
    %117 = arith.mulf %116, %116 : vector<16x128xf32>
    %cst_70 = arith.constant dense<0.000000e+00> : vector<16xf32>
    %118 = vector.multi_reduction <add>, %117, %cst_70 [1] : vector<16x128xf32> to vector<16xf32>
    %119 = vector.shape_cast %118 : vector<16xf32> to vector<16x1xf32>
    %cst_71 = arith.constant 1.280000e+02 : f32
    %120 = vector.broadcast %cst_71 : f32 to vector<16x1xf32>
    %121 = arith.divf %119, %120 : vector<16x1xf32>
    %122 = vector.broadcast %114 : vector<16x1xf32> to vector<16x128xf32>
    %123 = arith.subf %110, %122 : vector<16x128xf32>
    %cst_72 = arith.constant 9.99999974E-6 : f32
    %124 = vector.broadcast %cst_72 : f32 to vector<16x1xf32>
    %125 = arith.addf %121, %124 : vector<16x1xf32>
    %126 = math.rsqrt %125 : vector<16x1xf32>
    %127 = vector.broadcast %126 : vector<16x1xf32> to vector<16x128xf32>
    %128 = arith.mulf %123, %127 : vector<16x128xf32>
    %129 = vector.broadcast %5 : vector<1x128xf32> to vector<16x128xf32>
    %130 = arith.mulf %128, %129 : vector<16x128xf32>
    %131 = vector.broadcast %6 : vector<1x128xf32> to vector<16x128xf32>
    %132 = arith.addf %130, %131 : vector<16x128xf32>
    %133 = arith.truncf %132 : vector<16x128xf32> to vector<16x128xbf16>
    %c0_73 = arith.constant 0 : index
    %c0_74 = arith.constant 0 : index
    %134 = vector.load %arg5[%c0_73, %c0_74] : memref<128x256xbf16, #tpu.memory_space<vmem>>, vector<128x256xbf16>
    %cst_75 = arith.constant dense<0.000000e+00> : vector<16x256xf32>
    %135 = tpu.matmul %133, %134, %cst_75 {dimension_numbers = #tpu.dot_dimension_numbers<[1], [0], [0], [1], [0, 0, 1, 1], [], []>} : vector<16x128xbf16>, vector<128x256xbf16>, vector<16x256xf32> -> vector<16x256xf32>
    %136 = vector.broadcast %10 : vector<1x256xf32> to vector<16x256xf32>
    %137 = arith.addf %135, %136 : vector<16x256xf32>
    %cst_76 = arith.constant 0.000000e+00 : f32
    %138 = vector.broadcast %cst_76 : f32 to vector<16x256xf32>
    %139 = arith.maximumf %137, %138 : vector<16x256xf32>
    %140 = arith.truncf %139 : vector<16x256xf32> to vector<16x256xbf16>
    %c0_77 = arith.constant 0 : index
    %c0_78 = arith.constant 0 : index
    %141 = vector.load %arg6[%c0_77, %c0_78] : memref<256x128xbf16, #tpu.memory_space<vmem>>, vector<256x128xbf16>
    %cst_79 = arith.constant dense<0.000000e+00> : vector<16x128xf32>
    %142 = tpu.matmul %140, %141, %cst_79 {dimension_numbers = #tpu.dot_dimension_numbers<[1], [0], [0], [1], [0, 0, 1, 1], [], []>} : vector<16x256xbf16>, vector<256x128xbf16>, vector<16x128xf32> -> vector<16x128xf32>
    %143 = vector.broadcast %7 : vector<1x128xf32> to vector<16x128xf32>
    %144 = arith.addf %142, %143 : vector<16x128xf32>
    %145 = arith.addf %144, %132 : vector<16x128xf32>
    %cst_80 = arith.constant dense<0.000000e+00> : vector<16xf32>
    %146 = vector.multi_reduction <add>, %145, %cst_80 [1] : vector<16x128xf32> to vector<16xf32>
    %147 = vector.shape_cast %146 : vector<16xf32> to vector<16x1xf32>
    %cst_81 = arith.constant 1.280000e+02 : f32
    %148 = vector.broadcast %cst_81 : f32 to vector<16x1xf32>
    %149 = arith.divf %147, %148 : vector<16x1xf32>
    %150 = vector.broadcast %149 : vector<16x1xf32> to vector<16x128xf32>
    %151 = arith.subf %145, %150 : vector<16x128xf32>
    %152 = arith.mulf %151, %151 : vector<16x128xf32>
    %cst_82 = arith.constant dense<0.000000e+00> : vector<16xf32>
    %153 = vector.multi_reduction <add>, %152, %cst_82 [1] : vector<16x128xf32> to vector<16xf32>
    %154 = vector.shape_cast %153 : vector<16xf32> to vector<16x1xf32>
    %cst_83 = arith.constant 1.280000e+02 : f32
    %155 = vector.broadcast %cst_83 : f32 to vector<16x1xf32>
    %156 = arith.divf %154, %155 : vector<16x1xf32>
    %157 = vector.broadcast %149 : vector<16x1xf32> to vector<16x128xf32>
    %158 = arith.subf %145, %157 : vector<16x128xf32>
    %cst_84 = arith.constant 9.99999974E-6 : f32
    %159 = vector.broadcast %cst_84 : f32 to vector<16x1xf32>
    %160 = arith.addf %156, %159 : vector<16x1xf32>
    %161 = math.rsqrt %160 : vector<16x1xf32>
    %162 = vector.broadcast %161 : vector<16x1xf32> to vector<16x128xf32>
    %163 = arith.mulf %158, %162 : vector<16x128xf32>
    %164 = vector.broadcast %8 : vector<1x128xf32> to vector<16x128xf32>
    %165 = arith.mulf %163, %164 : vector<16x128xf32>
    %166 = vector.broadcast %9 : vector<1x128xf32> to vector<16x128xf32>
    %167 = arith.addf %165, %166 : vector<16x128xf32>
    %c0_85 = arith.constant 0 : index
    %c0_86 = arith.constant 0 : index
    %c0_87 = arith.constant 0 : index
    %168 = vector.load %arg9[%c0_85, %c0_86, %c0_87] : memref<1x16x128xf32, #tpu.memory_space<vmem>>, vector<1x16x128xf32>
    %169 = vector.shape_cast %168 : vector<1x16x128xf32> to vector<16x128xf32>
    %170 = vector.shape_cast %167 : vector<16x128xf32> to vector<1x16x128xf32>
    tpu.vector_store %arg9[%c0_85, %c0_86, %c0_87], %170 {strides = array<i32>} : memref<1x16x128xf32, #tpu.memory_space<vmem>>, vector<1x16x128xf32>,
    return
  }
  func.func @transform_0(%arg0: i32) -> (i32, i32, i32) {
    %c0_i32 = arith.constant 0 : i32
    %c0_i32_0 = arith.constant 0 : i32
    %c0_i32_1 = arith.constant 0 : i32
    return %arg0, %c0_i32, %c0_i32_0 : i32, i32, i32
  }
  func.func @transform_1(%arg0: i32) -> (i32, i32) {
    %c0_i32 = arith.constant 0 : i32
    %c0_i32_0 = arith.constant 0 : i32
    %c0_i32_1 = arith.constant 0 : i32
    return %c0_i32, %c0_i32_0 : i32, i32
  }
  func.func @transform_2(%arg0: i32) -> (i32, i32) {
    %c0_i32 = arith.constant 0 : i32
    %c0_i32_0 = arith.constant 0 : i32
    %c0_i32_1 = arith.constant 0 : i32
    return %c0_i32, %c0_i32_0 : i32, i32
  }
  func.func @transform_3(%arg0: i32) -> (i32, i32) {
    %c0_i32 = arith.constant 0 : i32
    %c0_i32_0 = arith.constant 0 : i32
    %c0_i32_1 = arith.constant 0 : i32
    return %c0_i32, %c0_i32_0 : i32, i32
  }
  func.func @transform_4(%arg0: i32) -> (i32, i32) {
    %c0_i32 = arith.constant 0 : i32
    %c0_i32_0 = arith.constant 0 : i32
    %c0_i32_1 = arith.constant 0 : i32
    return %c0_i32, %c0_i32_0 : i32, i32
  }
  func.func @transform_5(%arg0: i32) -> (i32, i32) {
    %c0_i32 = arith.constant 0 : i32
    %c0_i32_0 = arith.constant 0 : i32
    %c0_i32_1 = arith.constant 0 : i32
    return %c0_i32, %c0_i32_0 : i32, i32
  }
  func.func @transform_6(%arg0: i32) -> (i32, i32) {
    %c0_i32 = arith.constant 0 : i32
    %c0_i32_0 = arith.constant 0 : i32
    %c0_i32_1 = arith.constant 0 : i32
    return %c0_i32, %c0_i32_0 : i32, i32
  }
  func.func @transform_7(%arg0: i32) -> (i32, i32) {
    %c0_i32 = arith.constant 0 : i32
    %c0_i32_0 = arith.constant 0 : i32
    %c0_i32_1 = arith.constant 0 : i32
    return %c0_i32, %c0_i32_0 : i32, i32
  }
  func.func @transform_8(%arg0: i32) -> (i32, i32, i32) {
    %c0_i32 = arith.constant 0 : i32
    %c0_i32_0 = arith.constant 0 : i32
    %c0_i32_1 = arith.constant 0 : i32
    return %arg0, %c0_i32, %c0_i32_0 : i32, i32, i32
  }
}

</mosaic_0001>

<bundles_post_ra>
// kernel: tpu_custom_call.1
= control target key start
LH: loop header
LB: loop body
LE: loop exit
PB: predicated region body
PF: predicated region fallthrough
CT: control target
= control target key end

     0   :  { %s3186_s0 = inlined_call_operand.hbm [shape: bf16[2,16,128], index: 0, kind: input, shape index: {}]   ;;  %s3187_s1 = inlined_call_operand.hbm [shape: bf16[128,128], index: 1, kind: input, shape index: {}]   ;;  %s3188_s2 = inlined_call_operand.hbm [shape: bf16[128,128], index: 2, kind: input, shape index: {}]   ;;  %s3189_s3 = inlined_call_operand.hbm [shape: bf16[128,128], index: 3, kind: input, shape index: {}]   ;;  %s3190_s4 = inlined_call_operand.hbm [shape: bf16[128,256], index: 4, kind: input, shape index: {}]   ;;  %s3191_s5 = inlined_call_operand.hbm [shape: bf16[256,128], index: 5, kind: input, shape index: {}]   ;;  %s3192_s6 = inlined_call_operand.vmem [shape: f32[8,128], index: 6, kind: input, shape index: {}]   ;;  %s3193_s7 = inlined_call_operand.vmem [shape: f32[1,256], index: 7, kind: input, shape index: {}]   ;;  %s3194_s8 = inlined_call_operand.hbm [shape: f32[2,16,128], index: 8, kind: output, shape index: {}]  }
   0x1   :  { %3201 = sst [smem:[#allocation21_spill]] %s3187_s1 }
   0x2   :  { %3202 = sst [smem:[#allocation22_spill]] %s3188_s2 }
   0x3   :  { %13 = vsyncpa [#allocation5], 0 }
   0x4   :  { %15 = vsyncpa [#allocation5 + $0x1], 0 }
   0x5   :  { %16 = vsyncpa [#allocation8], 0 }
   0x6   :  { %17 = vsyncpa [#allocation11], 0 }
   0x7   :  { %18 = vsyncpa [#allocation14], 0 }
   0x8   :  { %19 = vsyncpa [#allocation6], 0 }
   0x9   :  { %21 = vsyncpa [#allocation6 + $0x1], 0  ;;  %s2770_s27 = smov 0   ;;  %s2772_s28 = smov 0  }
   0xa   :  { %s2774_s29 = smov 0   ;;  %s2776_s30 = smov 0  }
   0xb LB: > { %s2706_s9 = smov [#allocation7]   ;;  %s2791_s11 = sadd.s32 4294967295, %s2704_s30   ;;  %s2704_s30 = sphi %s2776_s30, %s3228_s30   ;;  %s2700_s29 = sphi %s2774_s29, %s3227_s29   ;;  %s2696_s28 = sphi %s2772_s28, %s3226_s28   ;;  %s2692_s27 = sphi %s2770_s27, %s3225_s27  }
   0xc   : > { %s243_s10 = sshll.u32 %s2706_s9, 4  ;;  %p1944_p0 = scmp.ge.s32.totalorder %s2704_s30, 1  ;;  %s244_s10 = int_to_ptr.vmem [resolvable:$true] %s243_s10 }
   0xd   : > { %p3197_p1 = scmp.eq.s32.totalorder %s2791_s11, 0  ;;  %p231_p2 = scmp.lt.s32.totalorder %s2704_s30, 3 }
   0xe   : > { %s2707_s13 = smov [#allocation10]   ;;  %s2708_s16 = smov [#allocation9]  }
   0xf   : > { %p2796_p3 = pnand %p1944_p0, %p231_p2  ;;  %s269_s14 = sshll.u32 %s2707_s13, 4  ;;  %s2809_s14 = int_to_ptr.vmem [resolvable:$true] %s269_s14 }
  0x10   : > { %s256_s17 = sshll.u32 %s2708_s16, 4  ;;  %s2481_s19 = scalar_lea.vmem %s244_s10, 1024  ;;  %s2811_s17 = int_to_ptr.vmem [resolvable:$true] %s256_s17 }
  0x11   : > { %s3203_s12 = scalar_select %p2796_p3, 1, 0 }
  0x12   : > { %p2278_p5 = pneg %p2796_p3  ;;  %p2482_p8 = scmp.ne.s32.totalorder %s244_s10, %s2481_s19 }
  0x13   : > { %p2489_p11 = scmp.lt.s32.totalorder %s244_s10, %s244_s10  ;;  %p2490_p12 = scmp.lt.s32.totalorder %s2481_s19, %s2481_s19 }
  0x14   : > { %p2805_p6 = pnand %p2278_p5, %p3197_p1 }
  0x15   : > { %p2491_p13 = por %p2490_p12, %p2489_p11 }
  0x16   : > { %p2815_p7 = pneg %p2805_p6 }
  0x18   : > { %p2484_p9 = pnand %p2482_p8, %p2815_p7 }
  0x1a   : > { %p2485_p10 = pneg %p2484_p9 }
  0x1c   : > { %p2492_p0 = pnand %p2491_p13, %p2485_p10 }
  0x1e   : > { %2495 = shalt.err (!%p2492_p0)
}
  0x1f   : > { %s3195_s20 = smov 64   ;;  %s3196_s21 = smov 4  }
  0x20   : > { %s3206_s1 = sld [smem:[#allocation21_spill]]  ;;  %s2507_s24 = scalar_lea.vmem %s2809_s14, 1024 }
  0x21   : > { %p2508_p2 = scmp.ne.s32.totalorder %s2809_s14, %s2507_s24  ;;  %p2515_p9 = scmp.lt.s32.totalorder %s2809_s14, %s2809_s14 }
  0x22   : > { %p2516_p10 = scmp.lt.s32.totalorder %s2507_s24, %s2507_s24 }
  0x23   : > { %p2510_p5 = pnand %p2508_p2, %p2815_p7 }
  0x24   : > { %p2517_p11 = por %p2516_p10, %p2515_p9 }
  0x25   : > { %p2511_p8 = pneg %p2510_p5 }
  0x26   : > { %2281 = dma.hbm_to_vmem [thread:$0]  (!%p2805_p6), %s3206_s1, 1024, %s244_s10, [#allocation8], %s3195_s20, %s3195_s20, %s3196_s21  }
  0x27   : > { %p2518_p12 = pnand %p2517_p11, %p2511_p8 }
  0x29   : > { %2521 = shalt.err (!%p2518_p12)
}
  0x2a   : > { %2287 = dma.hbm_to_vmem [thread:$0]  (!%p2805_p6), %s3189_s3, 1024, %s2809_s14, [#allocation11], %s3195_s20, %s3195_s20, %s3196_s21  }
  0x2b   : > { %s2533_s9 = scalar_lea.vmem %s2811_s17, 1024  ;;  %p2541_p5 = scmp.lt.s32.totalorder %s2811_s17, %s2811_s17 }
  0x2c   : > { %p2534_p13 = scmp.ne.s32.totalorder %s2811_s17, %s2533_s9  ;;  %p2542_p8 = scmp.lt.s32.totalorder %s2533_s9, %s2533_s9 }
  0x2e   : > { %p2536_p0 = pnand %p2534_p13, %p2815_p7  ;;  %p2543_p9 = por %p2542_p8, %p2541_p5 }
  0x30   : > { %p2537_p2 = pneg %p2536_p0 }
  0x32   : > { %p2544_p10 = pnand %p2543_p9, %p2537_p2 }
  0x34   : > { %2547 = shalt.err (!%p2544_p10)
}
  0x35   : > { %s3207_s2 = sld [smem:[#allocation22_spill]]  ;;  %s2711_s14 = smov [#allocation12]  }
  0x36   : > { %s282_s16 = sshll.u32 %s2711_s14, 4  ;;  %s283_s16 = int_to_ptr.vmem [resolvable:$true] %s282_s16 }
  0x37   : > { %s2559_s19 = scalar_lea.vmem %s283_s16, 2048  ;;  %p2567_p0 = scmp.lt.s32.totalorder %s283_s16, %s283_s16 }
  0x38   : > { %p2560_p11 = scmp.ne.s32.totalorder %s283_s16, %s2559_s19  ;;  %p2568_p2 = scmp.lt.s32.totalorder %s2559_s19, %s2559_s19 }
  0x3a   : > { %p2562_p12 = pnand %p2560_p11, %p2815_p7  ;;  %p2569_p5 = por %p2568_p2, %p2567_p0 }
  0x3b   : > { %2284 = dma.hbm_to_vmem [thread:$0]  (!%p2805_p6), %s3207_s2, 1024, %s2811_s17, [#allocation8], %s3195_s20, %s3195_s20, %s3196_s21  }
  0x3c   : > { %p2563_p13 = pneg %p2562_p12 }
  0x3e   : > { %p2570_p8 = pnand %p2569_p5, %p2563_p13 }
  0x40   : > { %2573 = shalt.err (!%p2570_p8)
}
  0x41   : > { %s2712_s22 = smov 128   ;;  %s2713_s23 = smov 8  }
  0x42   : > { %2290 = dma.hbm_to_vmem [thread:$0]  (!%p2805_p6), %s3190_s4, 2048, %s283_s16, [#allocation11], %s2712_s22, %s2712_s22, %s2713_s23  }
  0x43   : > { %s2714_s25 = smov [#allocation13]  }
  0x44   : > { %s295_s26 = sshll.u32 %s2714_s25, 4  ;;  %s296_s26 = int_to_ptr.vmem [resolvable:$true] %s295_s26 }
  0x45   : > { %s2585_s9 = scalar_lea.vmem %s296_s26, 2048  ;;  %p2593_p12 = scmp.lt.s32.totalorder %s296_s26, %s296_s26 }
  0x46   : > { %p2586_p9 = scmp.ne.s32.totalorder %s296_s26, %s2585_s9  ;;  %p2594_p13 = scmp.lt.s32.totalorder %s2585_s9, %s2585_s9 }
  0x48   : > { %p2588_p10 = pnand %p2586_p9, %p2815_p7  ;;  %p2595_p0 = por %p2594_p13, %p2593_p12 }
  0x4a   : > { %p2589_p11 = pneg %p2588_p10 }
  0x4c   : > { %p2596_p2 = pnand %p2595_p0, %p2589_p11 }
  0x4e   : > { %2599 = shalt.err (!%p2596_p2)
}
  0x4f   : > { %2293 = dma.hbm_to_vmem [thread:$0]  (!%p2805_p6), %s3191_s5, 2048, %s296_s26, [#allocation14], %s3195_s20, %s3195_s20, %s3196_s21  }
  0x50   : > { %s1943_s15 = sadd.s32 4294967294, %s2704_s30   ;;  %s2878_s18 = sadd.s32 1, %s2704_s30  }
  0x51   : > { %s34_s14 = sadd.s32 1, %s2700_s29  ;;  %s31_s16 = ssub.s32 %s2704_s30, %s2878_s18 }
  0x52   : > { %p41_p7 = scmp.ne.s32.totalorder %s2700_s29, %s2696_s28  ;;  %p32_p5 = scmp.eq.s32.totalorder %s31_s16, 0 }
  0x53   : > { %p42_p8 = scmp.eq.s32.totalorder %s2704_s30, 0  ;;  %p47_p9 = scmp.ne.s32.totalorder %s2696_s28, %s2692_s27 }
  0x54   : > { %p218_p10 = scmp.eq.s32.totalorder %s2791_s11, 1  ;;  %p224_p13 = scmp.eq.s32.totalorder %s1943_s15, 1 }
  0x55   : > { %s2890_s19 = scalar_select %p32_p5, %s2700_s29, %s34_s14  }
  0x56   : > { %p43_p11 = por %p42_p8, %p41_p7  ;;  %p2894_p12 = por %p3197_p1, %p47_p9 }
  0x57   : > { %p2898_p6 = por %p218_p10, %p41_p7  ;;  %p2307_p0 = scmp.lt.s32.totalorder %s2704_s30, 2 }
  0x58   : > { %s3208_s22 = scalar_select %p2894_p12, 1, 0 }
  0x59   : > { %s3209_s23 = scalar_select %p2898_p6, 1, 0 }
  0x5a   : > { %s315_s24 = sand.u32 1, %s2700_s29   ;;  %p2904_p2 = por %p224_p13, %p47_p9 }
  0x5b   : > { %s1951_s25 = sshll.u32 %s315_s24, 3  ;;  %s2050_s26 = sshll.u32 %s2704_s30, 7 }
  0x5c   : > { %s3210_s17 = scalar_select %p2904_p2, 1, 0 }
  0x5d   : > { %s2912_s13 = scalar_lea.hbm %s3186_s0, %s2050_s26  ;;  %s319_s14 = scalar_lea.vmem [#allocation4], %s1951_s25 }
  0x5e   : > { %s326_s16 = sshll.u32 %s319_s14, 4  ;;  %p2914_p7 = pnand %p2307_p0, %p43_p11  ;;  %s2918_s16 = int_to_ptr.vmem [resolvable:$true] %s326_s16 }
  0x5f   : > { %s2920_s20 = scalar_lea.sflag [#allocation5], %s315_s24  ;;  %s2600_s21 = scalar_lea.hbm %s2912_s13, 128 }
  0x60   : > { %p2601_p5 = scmp.ne.s32.totalorder %s2912_s13, %s2600_s21  ;;  %p2602_p8 = pneg %p2914_p7 }
  0x61   : > { %s2605_s25 = scalar_lea.hbm %s3186_s0, 256  ;;  %p2606_p11 = scmp.lt.s32.totalorder %s2912_s13, %s3186_s0 }
  0x62   : > { %p2603_p9 = pnand %p2602_p8, %p2601_p5  ;;  %p2607_p13 = scmp.lt.s32.totalorder %s2605_s25, %s2600_s21 }
  0x64   : > { %p2604_p10 = pneg %p2603_p9  ;;  %p2608_p0 = por %p2607_p13, %p2606_p11 }
  0x66   : > { %p2609_p4 = pnand %p2608_p0, %p2604_p10 }
  0x68   : > { %2612 = shalt.err (!%p2609_p4)
}
  0x69   : > { %s2613_s24 = scalar_lea.vmem %s2918_s16, 128  ;;  %s2715_s1 = smov [#allocation4]  }
  0x6a   : > { %p2614_p1 = scmp.ne.s32.totalorder %s2918_s16, %s2613_s24  ;;  %s2618_s2 = sshll.u32 %s2715_s1, 4  ;;  %s2619_s2 = int_to_ptr.vmem [resolvable:$false] %s2618_s2 }
  0x6b   : > { %s2620_s26 = scalar_lea.vmem %s2619_s2, 256  ;;  %p2621_p9 = scmp.lt.s32.totalorder %s2918_s16, %s2619_s2 }
  0x6c   : > { %p2616_p2 = pnand %p2614_p1, %p2602_p8  ;;  %p2622_p6 = scmp.lt.s32.totalorder %s2620_s26, %s2613_s24 }
  0x6e   : > { %p2617_p5 = pneg %p2616_p2  ;;  %p2623_p12 = por %p2622_p6, %p2621_p9 }
  0x70   : > { %p2624_p3 = pnand %p2623_p12, %p2617_p5 }
  0x72   : > { %2627 = shalt.err (!%p2624_p3)
}
  0x73   : > { %s3212_s21 = smov 4   ;;  %s3213_s9 = smov 64  }
  0x74   : > { %2297 = dma.hbm_to_vmem [thread:$0]  (!%p2914_p7), %s2912_s13, 128, %s2918_s16, %s2920_s20, %s3213_s9, %s3213_s9, %s3212_s21  }
  0x75   : > { %p3214_p1 = scmp.ne.s32.totalorder %s3203_s12, 0 }
  0x76   : > { %s2947_s1 = sand.u32 (!%p3214_p1), 1, %s2696_s28   ;;  %p3215_p3 = scmp.ne.s32.totalorder (!%p3214_p1), %s3208_s22, 0 }
  0x77   : > { %338 = sbr.rel (%p3214_p1) target bundleno = 3696 (0xe70), region = 52  ;;  %s1955_s2 = sshll.u32 (!%p3214_p1), %s2947_s1, 3 }
  0x78   : > { %s341_s25 = scalar_lea.sflag (!%p3214_p1), [#allocation5], %s2947_s1  ;;  %s2951_s10 = scalar_lea.vmem (!%p3214_p1), [#allocation4], %s1955_s2 }
  0x7c   : > { %2671 = dma.done.wait (%p3215_p3), %s341_s25, 128  }
  0x7d   : > { %2673 = vsyncadd (%p3215_p3), %s341_s25, 4294967168  ;;  %p3216_p4 = scmp.eq.s32.totalorder %s2791_s11, 0 }
  0x7f   : > { %2675 = dma.done.wait (%p3216_p4), [#allocation8], 2048   ;;  %p3217_p12 = pmov %p3216_p4 }
  0x80   : > { %p3218_p6 = pmov %p3216_p4 }
  0x81   : > { %2677 = vsyncadd (%p3217_p12), [#allocation8], 4294965248 }
  0x82   : > { %2679 = dma.done.wait (%p3218_p6), [#allocation11], 3072   ;;  %p3219_p2 = pmov %p3216_p4 }
  0x84   : > { %2681 = vsyncadd (%p3219_p2), [#allocation11], 4294964224  ;;  %p3220_p7 = pmov %p3219_p2 }
  0x85   : > { %p3221_p8 = pmov %p3219_p2 }
  0x86   : > { %2683 = dma.done.wait (%p3220_p7), [#allocation14], 2048  }
  0x87   : > { %2685 = vsyncadd (%p3221_p8), [#allocation14], 4294965248  ;;  %v2716_v0 = vmov 0.0   ;;  %vm2717_vm0 = vmmov 0   ;;  %v2363_v1 = vld [vmem:[#allocation9 + $0x38] sm:$0xff]   ;;  %v2365_v3 = vld [vmem:[#allocation9 + $0x30] sm:$0xff]  }
  0x88   : > { %2154 = vmatprep.subr.bf16.mxu1 %v2716_v0  ;;  %2134 = vmatprep.subr.bf16.mxu0 %v2716_v0  ;;  %v2364_v2 = vld [vmem:[#allocation7 + $0x38] sm:$0xff]   ;;  %v2366_v4 = vld [vmem:[#allocation7 + $0x30] sm:$0xff]   ;;  %v2367_v5 = vld [vmem:[#allocation9 + $0x28] sm:$0xff]   ;;  %vm667_vm1 = vcmask 261120   ;;  %s2718_s16 = smov 96   ;;  %vm717_vm2 = vcmask 130048  }
  0x89   : > { %2170 = vmatprep.mubr.msk.bf16.mxu1 %vm2717_vm0, %v2716_v0  ;;  %2150 = vmatprep.mubr.msk.bf16.mxu0 %vm2717_vm0, %v2716_v0  ;;  %v2368_v6 = vld [vmem:[#allocation7 + $0x28] sm:$0xff]   ;;  %v2369_v7 = vld [vmem:[#allocation9 + $0x20] sm:$0xff]   ;;  %v2371_v9 = vld [vmem:[#allocation9 + $0x18] sm:$0xff]   ;;  %s2719_s15 = smov 64   ;;  %s2720_s14 = smov 32  }
  0x8a   : > { %2155 = vmatpush3.bf16.msra.mxu1 %v2363_v1  ;;  %2135 = vmatpush3.bf16.msra.mxu0 %v2364_v2  ;;  %v2370_v8 = vld [vmem:[#allocation7 + $0x20] sm:$0xff]   ;;  %v2372_v10 = vld [vmem:[#allocation7 + $0x18] sm:$0xff]   ;;  %v2373_v11 = vld [vmem:[#allocation9 + $0x10] sm:$0xff]   ;;  %s2055_s26 = sshll.u32 %s2791_s11, 8  ;;  %s1809_s12 = scalar_lea.sflag [#allocation6], %s2947_s1 }
  0x8b   : > { %2156 = vmatprep.subr.bf16.mxu1 %v2716_v0  ;;  %2136 = vmatprep.subr.bf16.mxu0 %v2716_v0  ;;  %v2374_v12 = vld [vmem:[#allocation7 + $0x10] sm:$0xff]   ;;  %v2375_v13 = vld [vmem:[#allocation9 + $0x8] sm:$0xff]   ;;  %v2377_v15 = vld [vmem:[#allocation9] sm:$0xff]   ;;  %p3222_p11 = scmp.ne.s32.totalorder %s3209_s23, 0  ;;  %s2722_s11 = smov [#allocation15]  }
  0x8c   : > { %v2376_v14 = vld [vmem:[#allocation7 + $0x8] sm:$0xff]   ;;  %v2378_v16 = vld [vmem:[#allocation7] sm:$0xff]   ;;  %v2379_v17 = vld [vmem:[%s2951_s10] sm:$0xff]   ;;  %s3141_s10 = scalar_lea.hbm %s3194_s8, %s2055_s26  ;;  %s2632_s22 = sshll.u32 %s2722_s11, 4  ;;  %s2633_s22 = int_to_ptr.vmem [resolvable:$false] %s2632_s22 }
  0x8d   : > { %v1962_v19 = vld [vmem:[%s3192_s6] ss:$0 sm:$0xff]  ;;  %v1972_v21 = vld [vmem:[%s3192_s6 + $0x1] ss:$0 sm:$0xff]  ;;  %s2634_s13 = scalar_lea.vmem %s2633_s22, 512 }
  0x8e   : > { %2157 = vmatpush3.bf16.msra.mxu1 %v2365_v3  ;;  %2137 = vmatpush3.bf16.msra.mxu0 %v2366_v4 }
  0x8f   : > { %2158 = vmatprep.subr.bf16.mxu1 %v2716_v0  ;;  %2138 = vmatprep.subr.bf16.mxu0 %v2716_v0 }
  0x92   : > { %2159 = vmatpush3.bf16.msra.mxu1 %v2367_v5  ;;  %2139 = vmatpush3.bf16.msra.mxu0 %v2368_v6 }
  0x93   : > { %2160 = vmatprep.subr.bf16.mxu1 %v2716_v0  ;;  %2140 = vmatprep.subr.bf16.mxu0 %v2716_v0 }
  0x96   : > { %2161 = vmatpush3.bf16.msra.mxu1 %v2369_v7  ;;  %2141 = vmatpush3.bf16.msra.mxu0 %v2370_v8 }
  0x97   : > { %2162 = vmatprep.subr.bf16.mxu1 %v2716_v0  ;;  %2142 = vmatprep.subr.bf16.mxu0 %v2716_v0 }
  0x9a   : > { %2163 = vmatpush3.bf16.msra.mxu1 %v2371_v9  ;;  %2143 = vmatpush3.bf16.msra.mxu0 %v2372_v10 }
  0x9b   : > { %2164 = vmatprep.subr.bf16.mxu1 %v2716_v0  ;;  %2144 = vmatprep.subr.bf16.mxu0 %v2716_v0 }
  0x9e   : > { %2165 = vmatpush3.bf16.msra.mxu1 %v2373_v11  ;;  %2145 = vmatpush3.bf16.msra.mxu0 %v2374_v12 }
  0x9f   : > { %2166 = vmatprep.subr.bf16.mxu1 %v2716_v0  ;;  %2146 = vmatprep.subr.bf16.mxu0 %v2716_v0 }
  0xa2   : > { %2167 = vmatpush3.bf16.msra.mxu1 %v2375_v13  ;;  %2147 = vmatpush3.bf16.msra.mxu0 %v2376_v14 }
  0xa3   : > { %2168 = vmatprep.subr.bf16.mxu1 %v2716_v0  ;;  %2148 = vmatprep.subr.bf16.mxu0 %v2716_v0 }
  0xa6   : > { %2169 = vmatpush3.bf16.msra.mxu1 %v2377_v15  ;;  %2149 = vmatpush3.bf16.msra.mxu0 %v2378_v16 }
  0xa7   : > { %2180 = vmatprep.subr.bf16.mxu1 %v2716_v0  ;;  %2174 = vmatprep.subr.bf16.mxu0 %v2716_v0 }
  0xa9   : > { %2171 = vmatmul.mubr.bf16.vlgmr.msra.gmra.mxu1 %v2379_v17  ;;  %2151 = vmatmul.mubr.bf16.vlgmr.msra.gmra.mxu0 %v2379_v17 }
  0xaa   : > { %2182 = vmatprep.mubr.msk.bf16.mxu1 %vm2717_vm0, %v2716_v0  ;;  %2176 = vmatprep.mubr.msk.bf16.mxu0 %vm2717_vm0, %v2716_v0 }
 0x169   : > { %v626_v18 = vpop.f32.mrf.mxu1  ;;  %v517_v20 = vpop.f32.mrf.mxu0 }
 0x16a   : > { %v3002_v24 = vadd.f32 %v1962_v19, %v517_v20  ;;  %v627_v26 = vadd.f32 %v1972_v21, %v626_v18  ;;  %v2384_v20 = vld [vmem:[#allocation10 + $0x18] sm:$0xff]  }
 0x16b   : > { %v2172_v22 = vpop.f32.mrf.mxu1  ;;  %v2152_v23 = vpop.f32.mrf.mxu0 }
 0x16d   : > { %v629_v25 = vpop.f32.mrf.mxu1  ;;  %v520_v28 = vpop.f32.mrf.mxu0 }
 0x16e   : > { %v630_v27 = vadd.f32 %v1972_v21, %v629_v25  ;;  %v3004_v30 = vadd.f32 %v1962_v19, %v520_v28  ;;  %v2382_v28 = vld [vmem:[#allocation10 + $0x8] sm:$0xff]  }
 0x16f   : > { %v2173_v29 = vpop.f32.mrf.mxu1  ;;  %v2153_v32 = vpop.f32.mrf.mxu0 }
 0x170   : > { %v2064_v31 = vpack.c.bf16 %v630_v27, %v627_v26  ;;  %v2059_v33 = vpack.c.bf16 %v3004_v30, %v3002_v24  ;;  %v2385_v32 = vld [vmem:[#allocation10 + $0x10] sm:$0xff]  }
 0x172   : > { %2065 = vst [vmem:[#allocation3] sm:$0xff] %v2064_v31   ;;  %2060 = vst [vmem:[#allocation2] sm:$0xff] %v2059_v33   ;;  %v2383_v31 = vld [vmem:[#allocation10] sm:$0xff]  }
 0x179   : > { %v3008_v34 = vld [vmem:[#allocation3] sm:$0xff]   ;;  %v3014_v36 = vld [vmem:[#allocation2] sm:$0xff]  }
 0x17a   : > { %793 = vrot.lane.b32.xlu0 %v3008_v34, %s2718_s16  ;;  %2181 = vmatpush3.bf16.msra.mxu1 %v3008_v34  ;;  %v672_v35 = vsel %vm667_vm1, %v3008_v34, 0 }
 0x17b   : > { %2175 = vmatpush3.bf16.xpose.msra.mxu0 %v672_v35  ;;  %2192 = vmatprep.subr.bf16.mxu1 %v2716_v0 }
 0x17c   : > { %2186 = vmatprep.subr.bf16.mxu0 %v2716_v0 }
 0x17e   : > { %791 = vrot.lane.b32.xlu0 %v3014_v36, %s2718_s16 }
 0x182   : > { %2177 = vmatmul.mubr.msk.bf16.vlgmr.msra.gmra.mxu0 %vm667_vm1, %v3014_v36 }
 0x183   : > { %2188 = vmatprep.mubr.msk.bf16.mxu0 %vm2717_vm0, %v2716_v0 }
 0x1ec   : > { %v3023_v37 = vpop.permute.xlu0 %793 }
 0x1ed   : > { %v799_v38 = vsel %vm667_vm1, %v3023_v37, 0 }
 0x1ee   : > { %2187 = vmatpush3.bf16.xpose.msra.mxu0 %v799_v38 }
 0x1ef   : > { %2198 = vmatprep.subr.bf16.mxu0 %v2716_v0 }
 0x1f0   : > { %v792_v39 = vpop.permute.xlu0 %791 }
 0x1f5   : > { %2189 = vmatmul.mubr.msk.bf16.vlgmr.msra.gmra.mxu0 %vm667_vm1, %v792_v39 }
 0x1f6   : > { %2202 = vmatprep.mubr.msk.bf16.mxu0 %vm2717_vm0, %v2716_v0  ;;  %2199 = vmatpush3.bf16.msra.mxu0 %v2384_v20  ;;  %v2387_v20 = vld [vmem:[#allocation10 + $0x20] sm:$0xff]  }
 0x1f7   : > { %2200 = vmatprep.subr.bf16.mxu0 %v2716_v0 }
 0x1fa   : > { %2201 = vmatpush3.bf16.msra.mxu0 %v2385_v32 }
 0x1fb   : > { %2214 = vmatprep.subr.bf16.mxu0 %v2716_v0 }
 0x242   : > { %v708_v40 = vpop.f32.mrf.mxu0 }
 0x243   : > { %v715_v41 = vmul.f32 0.17677669, %v708_v40 }
 0x244   : > { %v2178_v42 = vpop.f32.mrf.mxu0 }
 0x245   : > { %v718_v43 = vsel %vm717_vm2, %v715_v41, -inf }
 0x246   : > { %719 = vmax.xlane.f32.xlu1 %v718_v43  ;;  %v711_v44 = vpop.f32.mrf.mxu0 }
 0x247   : > { %v716_v45 = vmul.f32 0.17677669, %v711_v44 }
 0x248   : > { %v2179_v46 = vpop.f32.mrf.mxu0 }
 0x249   : > { %v721_v47 = vsel %vm717_vm2, %v716_v45, -inf }
 0x24a   : > { %722 = vmax.xlane.f32.xlu1 %v721_v47 }
 0x2b5   : > { %v835_v48 = vpop.f32.mrf.mxu0 }
 0x2b6   : > { %v842_v49 = vmul.f32 0.17677669, %v835_v48 }
 0x2b7   : > { %v2190_v50 = vpop.f32.mrf.mxu0 }
 0x2b8   : > { %v844_v51 = vsel %vm717_vm2, %v842_v49, -inf }
 0x2b9   : > { %845 = vmax.xlane.f32.xlu0 %v844_v51  ;;  %v838_v52 = vpop.f32.mrf.mxu0 }
 0x2ba   : > { %v843_v53 = vmul.f32 0.17677669, %v838_v52 }
 0x2bb   : > { %v2191_v54 = vpop.f32.mrf.mxu0 }
 0x2bc   : > { %v847_v55 = vsel %vm717_vm2, %v843_v53, -inf }
 0x2bd   : > { %848 = vmax.xlane.f32.xlu1 %v847_v55 }
 0x2cf   : > { %v720_v56 = vpop.xlane.xlu1 %719  ;;  %1029 = vrot.lane.b32.xlu0 %v3014_v36, %s2719_s15 }
 0x2d0   : > { %v724_v57 = vsub.f32 %v715_v41, %v720_v56 }
 0x2d2   : > { %v726_v58 = vmul.f32 1.442695, %v724_v57 }
 0x2d3   : > { %v723_v59 = vpop.xlane.xlu1 %722 }
 0x2d4   : > { %2430 = vpow2.f32 %v726_v58  ;;  %v725_v60 = vsub.f32 %v716_v45, %v723_v59 }
 0x2d6   : > { %v728_v61 = vmul.f32 1.442695, %v725_v60 }
 0x2d8   : > { %2432 = vpow2.f32 %v728_v61 }
 0x2e1   : > { %v2431_v62 = vpop.eup %2430 }
 0x2e2   : > { %v730_v63 = vsel %vm717_vm2, %v2431_v62, 0.0 }
 0x2e3   : > { %731 = vadd.xlane.f32.xlu1 %v730_v63 }
 0x2e5   : > { %v2433_v1 = vpop.eup %2432 }
 0x2e6   : > { %v733_v2 = vsel %vm717_vm2, %v2433_v1, 0.0 }
 0x2e7   : > { %734 = vadd.xlane.f32.xlu1 %v733_v2 }
 0x342   : > { %v846_v3 = vpop.xlane.xlu0 %845 }
 0x343   : > { %v850_v4 = vsub.f32 %v842_v49, %v846_v3 }
 0x345   : > { %v852_v5 = vmul.f32 1.442695, %v850_v4 }
 0x346   : > { %v849_v6 = vpop.xlane.xlu1 %848  ;;  %v1030_v47 = vpop.permute.xlu0 %1029 }
 0x347   : > { %2434 = vpow2.f32 %v852_v5  ;;  %v851_v7 = vsub.f32 %v843_v53, %v849_v6 }
 0x349   : > { %v854_v8 = vmul.f32 1.442695, %v851_v7 }
 0x34b   : > { %2436 = vpow2.f32 %v854_v8 }
 0x354   : > { %v2435_v9 = vpop.eup %2434 }
 0x355   : > { %v856_v10 = vsel %vm717_vm2, %v2435_v9, 0.0 }
 0x356   : > { %857 = vadd.xlane.f32.xlu1 %v856_v10 }
 0x358   : > { %v2437_v11 = vpop.eup %2436 }
 0x359   : > { %v859_v12 = vsel %vm717_vm2, %v2437_v11, 0.0 }
 0x35a   : > { %860 = vadd.xlane.f32.xlu1 %v859_v12 }
 0x36b   : > { %1031 = vrot.lane.b32.xlu1 %v3008_v34, %s2719_s15  ;;  %s1961_s15 = sshll.u32 %s2947_s1, 4 }
 0x36c   : > { %v732_v13 = vpop.xlane.xlu1 %731  ;;  %s396_s21 = scalar_lea.vmem [#allocation15], %s1961_s15 }
 0x36d   : > { %2438 = vrcp.f32 %v732_v13  ;;  %s1822_s9 = sshll.u32 %s396_s21, 4  ;;  %s3143_s9 = int_to_ptr.vmem [resolvable:$true] %s1822_s9 }
 0x36e   : > { %s2628_s20 = scalar_lea.vmem %s3143_s9, 256  ;;  %p2635_p5 = scmp.lt.s32.totalorder %s3143_s9, %s2633_s22 }
 0x36f   : > { %p2629_p10 = scmp.ne.s32.totalorder %s3143_s9, %s2628_s20  ;;  %p2636_p9 = scmp.lt.s32.totalorder %s2634_s13, %s2628_s20 }
 0x370   : > { %v735_v14 = vpop.xlane.xlu1 %734 }
 0x371   : > { %2440 = vrcp.f32 %v735_v14  ;;  %p2630_p13 = pnand %p2629_p10, %p3222_p11  ;;  %p2637_p1 = por %p2636_p9, %p2635_p5 }
 0x373   : > { %p2631_p0 = pneg %p2630_p13 }
 0x375   : > { %p2638_p3 = pnand %p2637_p1, %p2631_p0 }
 0x37a   : > { %v2439_v15 = vpop.eup %2438 }
 0x37b   : > { %v738_v17 = vmul.f32 %v2439_v15, %v2431_v62 }
 0x37e   : > { %v2441_v16 = vpop.eup %2440 }
 0x37f   : > { %v739_v18 = vmul.f32 %v2441_v16, %v2433_v1 }
 0x381   : > { %v740_v19 = vpack.c.bf16 %v739_v18, %v738_v17 }
 0x383   : > { %2183 = vmatmul.mubr.msk.bf16.vlgmr.msra.gmra.mxu1 %vm717_vm2, %v740_v19 }
 0x384   : > { %2193 = vmatpush3.bf16.msra.mxu1 %v3023_v37  ;;  %2194 = vmatprep.mubr.msk.bf16.mxu1 %vm2717_vm0, %v2716_v0 }
 0x385   : > { %2206 = vmatprep.subr.bf16.mxu1 %v2716_v0 }
 0x3df   : > { %v858_v21 = vpop.xlane.xlu1 %857 }
 0x3e0   : > { %2442 = vrcp.f32 %v858_v21 }
 0x3e3   : > { %v861_v22 = vpop.xlane.xlu1 %860 }
 0x3e4   : > { %2444 = vrcp.f32 %v861_v22 }
 0x3e7   : > { %v1032_v40 = vpop.permute.xlu1 %1031 }
 0x3e8   : > { %v1037_v46 = vsel %vm667_vm1, %v1032_v40, 0 }
 0x3ed   : > { %v2443_v23 = vpop.eup %2442 }
 0x3ee   : > { %v864_v26 = vmul.f32 %v2443_v23, %v2435_v9 }
 0x3f1   : > { %v2445_v25 = vpop.eup %2444 }
 0x3f2   : > { %v865_v27 = vmul.f32 %v2445_v25, %v2437_v11  ;;  %v2386_v11 = vld [vmem:[#allocation10 + $0x28] sm:$0xff]  }
 0x3f4   : > { %v866_v29 = vpack.c.bf16 %v865_v27, %v864_v26 }
 0x3f6   : > { %2195 = vmatmul.mubr.msk.bf16.vlgmr.msra.gmra.mxu1 %vm717_vm2, %v866_v29 }
 0x3f7   : > { %2207 = vmatpush3.bf16.msra.mxu1 %v2382_v28  ;;  %2210 = vmatprep.mubr.msk.bf16.mxu1 %vm2717_vm0, %v2716_v0 }
 0x3f8   : > { %2208 = vmatprep.subr.bf16.mxu1 %v2716_v0 }
 0x3fb   : > { %2209 = vmatpush3.bf16.msra.mxu1 %v2383_v31 }
 0x3fc   : > { %2220 = vmatprep.subr.bf16.mxu1 %v2716_v0 }
 0x443   : > { %v779_v33 = vpop.f32.mrf.mxu1 }
 0x445   : > { %v2184_v35 = vpop.f32.mrf.mxu1 }
 0x447   : > { %v782_v37 = vpop.f32.mrf.mxu1 }
 0x448   : > { %v786_v38 = vpack.c.bf16 %v782_v37, %v779_v33 }
 0x449   : > { %v2185_v39 = vpop.f32.mrf.mxu1 }
 0x44a   : > { %2211 = vmatmul.mubr.msk.bf16.vlgmr.msra.gmra.mxu1 %vm667_vm1, %v786_v38 }
 0x44b   : > { %2221 = vmatpush3.bf16.msra.mxu1 %v1032_v40  ;;  %2222 = vmatprep.mubr.msk.bf16.mxu1 %vm2717_vm0, %v2716_v0 }
 0x44c   : > { %2234 = vmatprep.subr.bf16.mxu1 %v2716_v0 }
 0x4b6   : > { %v905_v41 = vpop.f32.mrf.mxu1 }
 0x4b8   : > { %v2196_v42 = vpop.f32.mrf.mxu1 }
 0x4ba   : > { %v908_v43 = vpop.f32.mrf.mxu1 }
 0x4bb   : > { %v912_v44 = vpack.c.bf16 %v908_v43, %v905_v41 }
 0x4bc   : > { %v2197_v45 = vpop.f32.mrf.mxu1 }
 0x4bd   : > { %2203 = vmatmul.mubr.msk.bf16.vlgmr.msra.gmra.mxu0 %vm667_vm1, %v912_v44 }
 0x4be   : > { %2215 = vmatpush3.bf16.xpose.msra.mxu0 %v1037_v46  ;;  %2216 = vmatprep.mubr.msk.bf16.mxu0 %vm2717_vm0, %v2716_v0 }
 0x4bf   : > { %2226 = vmatprep.subr.bf16.mxu0 %v2716_v0 }
 0x4c5   : > { %2217 = vmatmul.mubr.msk.bf16.vlgmr.msra.gmra.mxu0 %vm667_vm1, %v1030_v47 }
 0x4c6   : > { %2230 = vmatprep.mubr.msk.bf16.mxu0 %vm2717_vm0, %v2716_v0  ;;  %2227 = vmatpush3.bf16.msra.mxu0 %v2386_v11 }
 0x4c7   : > { %2228 = vmatprep.subr.bf16.mxu0 %v2716_v0 }
 0x4ca   : > { %2229 = vmatpush3.bf16.msra.mxu0 %v2387_v20 }
 0x4cb   : > { %2240 = vmatprep.subr.bf16.mxu0 %v2716_v0 }
 0x50a   : > { %v3065_v48 = vpop.f32.mrf.mxu1 }
 0x50c   : > { %v2212_v49 = vpop.f32.mrf.mxu1 }
 0x50e   : > { %v3067_v50 = vpop.f32.mrf.mxu1 }
 0x510   : > { %v2213_v51 = vpop.f32.mrf.mxu1 }
 0x57d   : > { %v3069_v52 = vpop.f32.mrf.mxu0 }
 0x57e   : > { %v1023_v49 = vadd.f32 %v3065_v48, %v3069_v52  ;;  %v2388_v48 = vld [vmem:[#allocation10 + $0x38] sm:$0xff]   ;;  %v2389_v52 = vld [vmem:[#allocation10 + $0x30] sm:$0xff]  }
 0x57f   : > { %v2204_v53 = vpop.f32.mrf.mxu0 }
 0x581   : > { %v3071_v54 = vpop.f32.mrf.mxu0 }
 0x583   : > { %v2205_v55 = vpop.f32.mrf.mxu0 }
 0x585   : > { %v1073_v56 = vpop.f32.mrf.mxu0 }
 0x586   : > { %v1080_v57 = vmul.f32 0.17677669, %v1073_v56  ;;  %v1026_v56 = vadd.f32 %v3067_v50, %v3071_v54 }
 0x587   : > { %v2218_v58 = vpop.f32.mrf.mxu0 }
 0x588   : > { %v1082_v59 = vsel %vm717_vm2, %v1080_v57, -inf }
 0x589   : > { %1083 = vmax.xlane.f32.xlu1 %v1082_v59  ;;  %v1076_v60 = vpop.f32.mrf.mxu0 }
 0x58a   : > { %v1081_v61 = vmul.f32 0.17677669, %v1076_v60 }
 0x58b   : > { %v2219_v62 = vpop.f32.mrf.mxu0 }
 0x58c   : > { %v1085_v63 = vsel %vm717_vm2, %v1081_v61, -inf }
 0x58d   : > { %1086 = vmax.xlane.f32.xlu0 %v1085_v63 }
 0x5a3   : > { %1213 = vrot.lane.b32.xlu0 %v3014_v36, %s2720_s14 }
 0x612   : > { %v1084_v1 = vpop.xlane.xlu1 %1083 }
 0x613   : > { %v1088_v2 = vsub.f32 %v1080_v57, %v1084_v1 }
 0x615   : > { %v1090_v3 = vmul.f32 1.442695, %v1088_v2 }
 0x616   : > { %v1087_v4 = vpop.xlane.xlu0 %1086 }
 0x617   : > { %2446 = vpow2.f32 %v1090_v3  ;;  %v1089_v5 = vsub.f32 %v1081_v61, %v1087_v4 }
 0x619   : > { %v1092_v6 = vmul.f32 1.442695, %v1089_v5 }
 0x61b   : > { %2448 = vpow2.f32 %v1092_v6 }
 0x624   : > { %v2447_v7 = vpop.eup %2446 }
 0x625   : > { %v1094_v8 = vsel %vm717_vm2, %v2447_v7, 0.0 }
 0x626   : > { %1095 = vadd.xlane.f32.xlu1 %v1094_v8 }
 0x628   : > { %v2449_v9 = vpop.eup %2448 }
 0x629   : > { %v1097_v10 = vsel %vm717_vm2, %v2449_v9, 0.0 }
 0x62a   : > { %1098 = vadd.xlane.f32.xlu1 %v1097_v10 }
 0x63b   : > { %1215 = vrot.lane.b32.xlu1 %v3008_v34, %s2720_s14  ;;  %v1214_v34 = vpop.permute.xlu0 %1213 }
 0x6af   : > { %v1096_v36 = vpop.xlane.xlu1 %1095 }
 0x6b0   : > { %2450 = vrcp.f32 %v1096_v36 }
 0x6b3   : > { %v1099_v12 = vpop.xlane.xlu1 %1098 }
 0x6b4   : > { %2452 = vrcp.f32 %v1099_v12 }
 0x6b7   : > { %v1216_v17 = vpop.permute.xlu1 %1215 }
 0x6b8   : > { %v1221_v19 = vsel %vm667_vm1, %v1216_v17, 0 }
 0x6bd   : > { %v2451_v13 = vpop.eup %2450 }
 0x6be   : > { %v1102_v15 = vmul.f32 %v2451_v13, %v2447_v7  ;;  %v2007_v7 = vld [vmem:[%s3192_s6 + $0x2] ss:$0 sm:$0xff] }
 0x6c1   : > { %v2453_v14 = vpop.eup %2452 }
 0x6c2   : > { %v1103_v16 = vmul.f32 %v2453_v14, %v2449_v9 }
 0x6c4   : > { %v1104_v18 = vpack.c.bf16 %v1103_v16, %v1102_v15  ;;  %v2390_v16 = vld [vmem:[#allocation12 + $0x70] ss:$8 sps:$4 sm:$0xff]  }
 0x6c6   : > { %2223 = vmatmul.mubr.msk.bf16.vlgmr.msra.gmra.mxu1 %vm717_vm2, %v1104_v18 }
 0x6c7   : > { %2235 = vmatpush3.bf16.xpose.msra.mxu1 %v1221_v19  ;;  %2236 = vmatprep.mubr.msk.bf16.mxu1 %vm2717_vm0, %v2716_v0 }
 0x6c8   : > { %2246 = vmatprep.subr.bf16.mxu1 %v2716_v0 }
 0x6ce   : > { %2237 = vmatmul.mubr.msk.bf16.vlgmr.msra.gmra.mxu1 %vm667_vm1, %v1214_v34 }
 0x6cf   : > { %2250 = vmatprep.mubr.msk.bf16.mxu1 %vm2717_vm0, %v2716_v0  ;;  %2247 = vmatpush3.bf16.msra.mxu1 %v2388_v48 }
 0x6d0   : > { %2248 = vmatprep.subr.bf16.mxu1 %v2716_v0 }
 0x6d3   : > { %2249 = vmatpush3.bf16.msra.mxu1 %v2389_v52  ;;  %v2009_v52 = vld [vmem:[%s3192_s6 + $0x4] ss:$0 sm:$0xff] }
 0x786   : > { %v1143_v21 = vpop.f32.mrf.mxu1 }
 0x788   : > { %v2224_v22 = vpop.f32.mrf.mxu1 }
 0x78a   : > { %v1146_v23 = vpop.f32.mrf.mxu1 }
 0x78b   : > { %v1150_v25 = vpack.c.bf16 %v1146_v23, %v1143_v21  ;;  %v2395_v23 = vld [vmem:[#allocation12 + $0x64] ss:$8 sps:$4 sm:$0xff]  }
 0x78c   : > { %v2225_v26 = vpop.f32.mrf.mxu1 }
 0x78d   : > { %2231 = vmatmul.mubr.msk.bf16.vlgmr.msra.gmra.mxu0 %vm667_vm1, %v1150_v25  ;;  %v2393_v25 = vld [vmem:[#allocation12 + $0x60] ss:$8 sps:$4 sm:$0xff]   ;;  %v2398_v26 = vld [vmem:[#allocation12 + $0x54] ss:$8 sps:$4 sm:$0xff]  }
 0x78e   : > { %2241 = vmatpush3.bf16.msra.mxu0 %v1216_v17  ;;  %v1257_v27 = vpop.f32.mrf.mxu1  ;;  %2242 = vmatprep.mubr.msk.bf16.mxu0 %vm2717_vm0, %v2716_v0  ;;  %v2392_v17 = vld [vmem:[#allocation12 + $0x74] ss:$8 sps:$4 sm:$0xff]  }
 0x78f   : > { %v1264_v28 = vmul.f32 0.17677669, %v1257_v27  ;;  %1548 = vmatprep.subr.bf16.mxu0 %v2392_v17  ;;  %v2396_v27 = vld [vmem:[#allocation12 + $0x50] ss:$8 sps:$4 sm:$0xff]  }
 0x790   : > { %v2238_v29 = vpop.f32.mrf.mxu1 }
 0x791   : > { %v1266_v31 = vsel %vm717_vm2, %v1264_v28, -inf  ;;  %v2401_v29 = vld [vmem:[#allocation12 + $0x44] ss:$8 sps:$4 sm:$0xff]  }
 0x792   : > { %1267 = vmax.xlane.f32.xlu1 %v1266_v31  ;;  %v1260_v32 = vpop.f32.mrf.mxu1  ;;  %v2404_v31 = vld [vmem:[#allocation12 + $0x34] ss:$8 sps:$4 sm:$0xff]  }
 0x793   : > { %v1265_v33 = vmul.f32 0.17677669, %v1260_v32  ;;  %v2402_v32 = vld [vmem:[#allocation12 + $0x30] ss:$8 sps:$4 sm:$0xff]  }
 0x794   : > { %v2239_v35 = vpop.f32.mrf.mxu1 }
 0x795   : > { %v1269_v37 = vsel %vm717_vm2, %v1265_v33, -inf  ;;  %v2407_v35 = vld [vmem:[#allocation12 + $0x24] ss:$8 sps:$4 sm:$0xff]  }
 0x796   : > { %1270 = vmax.xlane.f32.xlu0 %v1269_v37  ;;  %v2405_v37 = vld [vmem:[#allocation12 + $0x20] ss:$8 sps:$4 sm:$0xff]  }
 0x81b   : > { %v1268_v38 = vpop.xlane.xlu1 %1267 }
 0x81c   : > { %v1272_v39 = vsub.f32 %v1264_v28, %v1268_v38  ;;  %v2399_v28 = vld [vmem:[#allocation12 + $0x40] ss:$8 sps:$4 sm:$0xff]   ;;  %v2410_v38 = vld [vmem:[#allocation12 + $0x14] ss:$8 sps:$4 sm:$0xff]  }
 0x81e   : > { %v1274_v40 = vmul.f32 1.442695, %v1272_v39  ;;  %v2408_v39 = vld [vmem:[#allocation12 + $0x10] ss:$8 sps:$4 sm:$0xff]  }
 0x81f   : > { %v1271_v41 = vpop.xlane.xlu0 %1270 }
 0x820   : > { %2454 = vpow2.f32 %v1274_v40  ;;  %v1273_v42 = vsub.f32 %v1265_v33, %v1271_v41  ;;  %v2721_v33 = vmov 0   ;;  %v2413_v40 = vld [vmem:[#allocation12 + $0x4] ss:$8 sps:$4 sm:$0xff]   ;;  %v2411_v41 = vld [vmem:[#allocation12] ss:$8 sps:$4 sm:$0xff]  }
 0x822   : > { %v1276_v43 = vmul.f32 1.442695, %v1273_v42  ;;  %v2414_v42 = vld [vmem:[#allocation13 + $0x78] sm:$0xff]  }
 0x823   : > { %2112 = vmatprep.subr.bf16.mxu1 %v2414_v42 }
 0x824   : > { %2456 = vpow2.f32 %v1276_v43  ;;  %v2415_v43 = vld [vmem:[#allocation13 + $0x38] sm:$0xff]  }
 0x82d   : > { %v2455_v44 = vpop.eup %2454 }
 0x82e   : > { %v1278_v45 = vsel %vm717_vm2, %v2455_v44, 0.0 }
 0x82f   : > { %1279 = vadd.xlane.f32.xlu1 %v1278_v45  ;;  %v2417_v45 = vld [vmem:[#allocation13 + $0x30] sm:$0xff]  }
 0x831   : > { %v2457_v46 = vpop.eup %2456 }
 0x832   : > { %v1281_v47 = vsel %vm717_vm2, %v2457_v46, 0.0 }
 0x833   : > { %1282 = vadd.xlane.f32.xlu0 %v1281_v47  ;;  %v2419_v47 = vld [vmem:[#allocation13 + $0x28] sm:$0xff]  }
 0x84d   : > { %v1204_v51 = vpop.f32.mrf.mxu0 }
 0x84e   : > { %v1211_v53 = vadd.f32 %v1204_v51, %v1023_v49  ;;  %v2420_v49 = vld [vmem:[#allocation13 + $0x60] sm:$0xff]  }
 0x84f   : > { %v2232_v55 = vpop.f32.mrf.mxu0  ;;  %v2421_v51 = vld [vmem:[#allocation13 + $0x20] sm:$0xff]  }
 0x850   : > { %v2423_v55 = vld [vmem:[#allocation13 + $0x18] sm:$0xff]  }
 0x851   : > { %v1207_v57 = vpop.f32.mrf.mxu0 }
 0x852   : > { %v1212_v58 = vadd.f32 %v1207_v57, %v1026_v56 }
 0x853   : > { %v2233_v59 = vpop.f32.mrf.mxu0 }
 0x8b8   : > { %v1280_v60 = vpop.xlane.xlu1 %1279 }
 0x8b9   : > { %2458 = vrcp.f32 %v1280_v60 }
 0x8bc   : > { %v1283_v61 = vpop.xlane.xlu0 %1282 }
 0x8bd   : > { %2460 = vrcp.f32 %v1283_v61 }
 0x8c6   : > { %v2459_v62 = vpop.eup %2458 }
 0x8c7   : > { %v1286_v1 = vmul.f32 %v2459_v62, %v2455_v44  ;;  %v2416_v44 = vld [vmem:[#allocation13 + $0x70] sm:$0xff]  }
 0x8ca   : > { %v2461_v63 = vpop.eup %2460 }
 0x8cb   : > { %v1287_v2 = vmul.f32 %v2461_v63, %v2457_v46  ;;  %v2418_v46 = vld [vmem:[#allocation13 + $0x68] sm:$0xff]  }
 0x8cd   : > { %v1288_v3 = vpack.c.bf16 %v1287_v2, %v1286_v1  ;;  %v2008_v1 = vld [vmem:[%s3192_s6 + $0x3] ss:$0 sm:$0xff] }
 0x8cf   : > { %2243 = vmatmul.mubr.msk.bf16.vlgmr.msra.gmra.mxu0 %vm717_vm2, %v1288_v3 }
 0x8d0   : > { %1549 = vmatpush1.bf16.msra.mxu0 %v2390_v16  ;;  %1580 = vmatprep.mubr.bf16.mxu0 %v2721_v33 }
 0x8d1   : > { %1550 = vmatprep.subr.bf16.mxu0 %v2395_v23 }
 0x8d4   : > { %1551 = vmatpush1.bf16.msra.mxu0 %v2393_v25 }
 0x8d5   : > { %1552 = vmatprep.subr.bf16.mxu0 %v2398_v26 }
 0x8d8   : > { %1553 = vmatpush1.bf16.msra.mxu0 %v2396_v27 }
 0x8d9   : > { %1554 = vmatprep.subr.bf16.mxu0 %v2401_v29 }
 0x8dc   : > { %1555 = vmatpush1.bf16.msra.mxu0 %v2399_v28 }
 0x8dd   : > { %1556 = vmatprep.subr.bf16.mxu0 %v2404_v31  ;;  %v2026_v31 = vld [vmem:[%s3192_s6 + $0x5] ss:$0 sm:$0xff] }
 0x8e0   : > { %1557 = vmatpush1.bf16.msra.mxu0 %v2402_v32 }
 0x8e1   : > { %1558 = vmatprep.subr.bf16.mxu0 %v2407_v35 }
 0x8e4   : > { %1559 = vmatpush1.bf16.msra.mxu0 %v2405_v37 }
 0x8e5   : > { %1560 = vmatprep.subr.bf16.mxu0 %v2410_v38 }
 0x8e8   : > { %1561 = vmatpush1.bf16.msra.mxu0 %v2408_v39 }
 0x8e9   : > { %1562 = vmatprep.subr.bf16.mxu0 %v2413_v40 }
 0x8ec   : > { %1563 = vmatpush1.bf16.msra.mxu0 %v2411_v41 }
 0x98f   : > { %v1327_v50 = vpop.f32.mrf.mxu0 }
 0x991   : > { %v2244_v54 = vpop.f32.mrf.mxu0 }
 0x993   : > { %v1330_v4 = vpop.f32.mrf.mxu0 }
 0x994   : > { %v1334_v5 = vpack.c.bf16 %v1330_v4, %v1327_v50 }
 0x995   : > { %v2245_v6 = vpop.f32.mrf.mxu0 }
 0x996   : > { %2251 = vmatmul.mubr.msk.bf16.vlgmr.msra.gmra.mxu1 %vm667_vm1, %v1334_v5  ;;  %v2424_v6 = vld [vmem:[#allocation13 + $0x50] sm:$0xff]  }
 0x997   : > { %2113 = vmatpush3.bf16.msra.mxu1 %v2415_v43 }
 0x998   : > { %2114 = vmatprep.subr.bf16.mxu1 %v2416_v44 }
 0x99b   : > { %2115 = vmatpush3.bf16.msra.mxu1 %v2417_v45 }
 0x99c   : > { %2116 = vmatprep.subr.bf16.mxu1 %v2418_v46 }
 0x99f   : > { %2117 = vmatpush3.bf16.msra.mxu1 %v2419_v47 }
 0x9a0   : > { %2118 = vmatprep.subr.bf16.mxu1 %v2420_v49 }
 0x9a3   : > { %2119 = vmatpush3.bf16.msra.mxu1 %v2421_v51 }
 0xa56   : > { %v1388_v8 = vpop.f32.mrf.mxu1 }
 0xa57   : > { %v1395_v9 = vadd.f32 %v1388_v8, %v1211_v53  ;;  %v2422_v53 = vld [vmem:[#allocation13 + $0x58] sm:$0xff]   ;;  %v2426_v8 = vld [vmem:[#allocation13 + $0x48] sm:$0xff]  }
 0xa58   : > { %v2252_v10 = vpop.f32.mrf.mxu1  ;;  %2120 = vmatprep.subr.bf16.mxu1 %v2422_v53 }
 0xa59   : > { %v1401_v11 = vadd.f32 %v2007_v7, %v1395_v9  ;;  %2121 = vmatpush3.bf16.msra.mxu1 %v2423_v55  ;;  %v2427_v9 = vld [vmem:[#allocation13 + $0x8] sm:$0xff]   ;;  %v2428_v10 = vld [vmem:[#allocation13 + $0x40] sm:$0xff]  }
 0xa5a   : > { %v1391_v36 = vpop.f32.mrf.mxu1  ;;  %2122 = vmatprep.subr.bf16.mxu1 %v2424_v6 }
 0xa5b   : > { %v1396_v12 = vadd.f32 %v1391_v36, %v1212_v58  ;;  %v1403_v0 = vadd.f32 %v1401_v11, %v3002_v24  ;;  %v2429_v11 = vld [vmem:[#allocation13] sm:$0xff]   ;;  %v1458_v36 = vlaneseq }
 0xa5c   : > { %v2253_v13 = vpop.f32.mrf.mxu1 }
 0xa5d   : > { %v1402_v14 = vadd.f32 %v2007_v7, %v1396_v12  ;;  %1405 = vadd.xlane.f32.xlu1 %v1403_v0  ;;  %v2425_v7 = vld [vmem:[#allocation13 + $0x10] sm:$0xff]   ;;  %v1459_v12 = vshrl.u32 %v1458_v36, 7 }
 0xa5e   : > { %2123 = vmatpush3.bf16.msra.mxu1 %v2425_v7 }
 0xa5f   : > { %v1404_v15 = vadd.f32 %v1402_v14, %v3004_v30  ;;  %2124 = vmatprep.subr.bf16.mxu1 %v2426_v8  ;;  %v1460_v13 = vsub.s32 0, %v1459_v12  ;;  %v408_v14 = vld [vmem:[%s3193_s7] sm:$0x3] }
 0xa61   : > { %1407 = vadd.xlane.f32.xlu0 %v1404_v15  ;;  %v1461_v17 = vrot.slane %v408_v14, %v1460_v13 }
 0xa62   : > { %2125 = vmatpush3.bf16.msra.mxu1 %v2427_v9 }
 0xa63   : > { %2126 = vmatprep.subr.bf16.mxu1 %v2428_v10 }
 0xa66   : > { %2127 = vmatpush3.bf16.msra.mxu1 %v2429_v11 }
 0xae6   : > { %v1406_v18 = vpop.xlane.xlu1 %1405 }
 0xae7   : > { %v1410_v19 = vmul.f32 0.0078125, %v1406_v18 }
 0xae9   : > { %v3108_v34 = vsub.f32 %v1403_v0, %v1410_v19  ;;  %v1464_v0 = vsub.s32 1, %v1459_v12 }
 0xaea   : > { %v1408_v20 = vpop.xlane.xlu0 %1407 }
 0xaeb   : > { %v1411_v21 = vmul.f32 0.0078125, %v1408_v20  ;;  %v1414_v22 = vmul.f32 %v3108_v34, %v3108_v34  ;;  %v1465_v16 = vrot.slane %v408_v14, %v1464_v0 }
 0xaed   : > { %v3112_v24 = vsub.f32 %v1404_v15, %v1411_v21  ;;  %1416 = vadd.xlane.f32.xlu1 %v1414_v22 }
 0xaef   : > { %v1415_v30 = vmul.f32 %v3112_v24, %v3112_v24 }
 0xaf1   : > { %1418 = vadd.xlane.f32.xlu0 %v1415_v30 }
 0xb76   : > { %v1417_v56 = vpop.xlane.xlu1 %1416 }
 0xb77   : > { %v1420_v57 = vmul.f32 0.0078125, %v1417_v56 }
 0xb79   : > { %v1422_v58 = vadd.f32 1e-05, %v1420_v57 }
 0xb7a   : > { %v1419_v59 = vpop.xlane.xlu0 %1418 }
 0xb7b   : > { %2462 = vrsqrt.f32 %v1422_v58  ;;  %v1421_v60 = vmul.f32 0.0078125, %v1419_v59 }
 0xb7d   : > { %v1423_v61 = vadd.f32 1e-05, %v1421_v60 }
 0xb7f   : > { %2464 = vrsqrt.f32 %v1423_v61 }
 0xb88   : > { %v2463_v62 = vpop.eup %2462 }
 0xb89   : > { %v1426_v63 = vmul.f32 %v2463_v62, %v3108_v34  ;;  %v2043_v62 = vld [vmem:[%s3192_s6 + $0x6] ss:$0 sm:$0xff] }
 0xb8b   : > { %v1432_v48 = vmul.f32 %v2008_v1, %v1426_v63 }
 0xb8c   : > { %v2465_v2 = vpop.eup %2464 }
 0xb8d   : > { %v1427_v3 = vmul.f32 %v2465_v2, %v3112_v24  ;;  %v1438_v54 = vadd.f32 %v2009_v52, %v1432_v48 }
 0xb8f   : > { %v1433_v50 = vmul.f32 %v2008_v1, %v1427_v3  ;;  %v2044_v1 = vld [vmem:[%s3192_s6 + $0x7] ss:$0 sm:$0xff] }
 0xb91   : > { %v1439_v4 = vadd.f32 %v2009_v52, %v1433_v50 }
 0xb93   : > { %v1440_v5 = vpack.c.bf16 %v1439_v4, %v1438_v54 }
 0xb95   : > { %1581 = vmatmul.mubr.bf16.vlgmr.msra.gmra.mxu0 %v1440_v5 }
 0xc55   : > { %v1582_v15 = vpop.f32.mrf.mxu0 }
 0xc56   : > { %v1583_v21 = vadd.f32 %v1582_v15, %v1461_v17 }
 0xc57   : > { %v1584_v18 = vpop.f32.mrf.mxu0 }
 0xc58   : > { %v1585_v34 = vadd.f32 %v1584_v18, %v1465_v16  ;;  %v1591_v26 = vmax.f32 %v1583_v21, 0.0 }
 0xc59   : > { %v1586_v19 = vpop.f32.mrf.mxu0 }
 0xc5a   : > { %v1587_v20 = vadd.f32 %v1586_v19, %v1461_v17  ;;  %v1592_v23 = vmax.f32 %v1585_v34, 0.0 }
 0xc5b   : > { %v1588_v22 = vpop.f32.mrf.mxu0 }
 0xc5c   : > { %v1589_v24 = vadd.f32 %v1588_v22, %v1465_v16  ;;  %v1593_v30 = vmax.f32 %v1587_v20, 0.0 }
 0xc5e   : > { %v1594_v25 = vmax.f32 %v1589_v24, 0.0  ;;  %v1595_v28 = vpack.c.bf16 %v1593_v30, %v1591_v26 }
 0xc60   : > { %v1596_v27 = vpack.c.bf16 %v1594_v25, %v1592_v23 }
 0xc62   : > { %1761 = vmatprep.mubr.bf16.mxu1 %v1596_v27 }
 0xc63   : > { %1762 = vmatmul.mubr.bf16.vlgmr.msra.gmra.mxu1 %v1595_v28 }
 0xd23   : > { %v2128_v29 = vpop.f32.mrf.mxu1 }
 0xd25   : > { %v2129_v32 = vpop.f32.mrf.mxu1 }
 0xd26   : > { %v2130_v33 = vadd.f32 %v2129_v32, %v2128_v29 }
 0xd27   : > { %v2131_v35 = vpop.f32.mrf.mxu1 }
 0xd28   : > { %v1764_v37 = vadd.f32 %v2130_v33, %v2026_v31 }
 0xd29   : > { %v2132_v38 = vpop.f32.mrf.mxu1 }
 0xd2a   : > { %v2133_v39 = vadd.f32 %v2132_v38, %v2131_v35  ;;  %v1770_v40 = vadd.f32 %v1764_v37, %v1438_v54 }
 0xd2c   : > { %v1767_v41 = vadd.f32 %v2133_v39, %v2026_v31  ;;  %1772 = vadd.xlane.f32.xlu1 %v1770_v40 }
 0xd2e   : > { %v1771_v42 = vadd.f32 %v1767_v41, %v1439_v4 }
 0xd30   : > { %1774 = vadd.xlane.f32.xlu0 %v1771_v42 }
 0xdb5   : > { %v1773_v43 = vpop.xlane.xlu1 %1772 }
 0xdb6   : > { %v1776_v44 = vmul.f32 0.0078125, %v1773_v43 }
 0xdb8   : > { %v1778_v45 = vsub.f32 %v1770_v40, %v1776_v44 }
 0xdb9   : > { %v1775_v46 = vpop.xlane.xlu0 %1774 }
 0xdba   : > { %v1777_v47 = vmul.f32 0.0078125, %v1775_v46  ;;  %v1780_v49 = vmul.f32 %v1778_v45, %v1778_v45 }
 0xdbc   : > { %v1779_v51 = vsub.f32 %v1771_v42, %v1777_v47  ;;  %1782 = vadd.xlane.f32.xlu1 %v1780_v49 }
 0xdbe   : > { %v1781_v53 = vmul.f32 %v1779_v51, %v1779_v51 }
 0xdc0   : > { %1784 = vadd.xlane.f32.xlu0 %v1781_v53 }
 0xe45   : > { %v1783_v55 = vpop.xlane.xlu1 %1782 }
 0xe46   : > { %v1786_v56 = vmul.f32 0.0078125, %v1783_v55 }
 0xe48   : > { %v1788_v57 = vadd.f32 1e-05, %v1786_v56 }
 0xe49   : > { %v1785_v58 = vpop.xlane.xlu0 %1784 }
 0xe4a   : > { %2466 = vrsqrt.f32 %v1788_v57  ;;  %v1787_v59 = vmul.f32 0.0078125, %v1785_v58 }
 0xe4c   : > { %v1789_v60 = vadd.f32 1e-05, %v1787_v59 }
 0xe4e   : > { %2468 = vrsqrt.f32 %v1789_v60 }
 0xe57   : > { %v2467_v61 = vpop.eup %2466 }
 0xe58   : > { %v1792_v63 = vmul.f32 %v2467_v61, %v1778_v45 }
 0xe5a   : > { %v1798_v2 = vmul.f32 %v2043_v62, %v1792_v63 }
 0xe5b   : > { %v2469_v3 = vpop.eup %2468 }
 0xe5c   : > { %v1804_v48 = vadd.f32 %v2044_v1, %v1798_v2  ;;  %v1793_v52 = vmul.f32 %v2469_v3, %v1779_v51 }
 0xe5e   : > { %v1799_v50 = vmul.f32 %v2043_v62, %v1793_v52  ;;  %1806 = vst [vmem:[%s396_s21] sm:$0xff] %v1804_v48 }
 0xe60   : > { %v1805_v54 = vadd.f32 %v2044_v1, %v1799_v50 }
 0xe62   : > { %1807 = vst [vmem:[%s396_s21 + $0x8] sm:$0xff] %v1805_v54 }
 0xe63   : > { %2641 = shalt.err (!%p2638_p3)
}
 0xe64   : > { %s2642_s16 = scalar_lea.hbm %s3141_s10, 256  ;;  %s2646_s24 = scalar_lea.hbm %s3194_s8, 512 }
 0xe65   : > { %p2643_p4 = scmp.ne.s32.totalorder %s3141_s10, %s2642_s16  ;;  %p2647_p2 = scmp.lt.s32.totalorder %s3141_s10, %s3194_s8 }
 0xe66   : > { %p2648_p7 = scmp.lt.s32.totalorder %s2646_s24, %s2642_s16 }
 0xe67   : > { %p2644_p12 = pnand %p2643_p4, %p3222_p11 }
 0xe68   : > { %p2649_p8 = por %p2648_p7, %p2647_p2 }
 0xe69   : > { %p2645_p6 = pneg %p2644_p12 }
 0xe6b   : > { %p2650_p10 = pnand %p2649_p8, %p2645_p6 }
 0xe6d   : > { %2653 = shalt.err (!%p2650_p10)
}
 0xe6e   : > { %s2723_s2 = smov 128   ;;  %s2724_s25 = smov 8  }
 0xe6f   : > { %2276 = dma.vmem_to_hbm [thread:$0]  (%p3222_p11), %s3143_s9, 256, %s3141_s10, %s1809_s12, %s2723_s2, %s2723_s2, %s2724_s25  }
 0xe70 PF: > { %s1837_s20 = sand.u32 1, %s2692_s27   ;;  %p3223_p13 = scmp.ne.s32.totalorder %s3210_s17, 0 }
 0xe71   : > { %p3224_p0 = scmp.ge.s32.totalorder %s2704_s30, 2  ;;  %s1838_s11 = scalar_lea.sflag [#allocation6], %s1837_s20 }
 0xe73   : > { %p2299_p5 = pnand %p3224_p0, %p3223_p13 }
 0xe75   : > { %p2300_p9 = pneg %p2299_p5 }
 0xe77   : > { %2687 = dma.done.wait (%p2300_p9), %s1838_s11, 256  }
 0xe78   : > { %2689 = vsyncadd (%p2300_p9), %s1838_s11, 4294967040  ;;  %p24_p1 = scmp.ge.s32.totalorder %s2878_s18, 4   ;;  %s3225_s27 = smov %s2696_s28 }
 0xe79   : > { %s3226_s28 = smov %s2700_s29  ;;  %s3227_s29 = smov %s2890_s19 }
 0xe7a   : > { %s3228_s30 = smov %s2878_s18  ;;  %26 = sbr.rel (!%p24_p1) target bundleno = 11 (0xb), region = 117 }
 0xe7f   :  { %1843 = vsyncpa [#allocation5], 1 }
 0xe80   :  { %1845 = vsyncpa [#allocation5 + $0x1], 1 }
 0xe81   :  { %1846 = vsyncpa [#allocation8], 1 }
 0xe82   :  { %1847 = vsyncpa [#allocation11], 1 }
 0xe83   :  { %1848 = vsyncpa [#allocation14], 1 }
 0xe84   :  { %1849 = vsyncpa [#allocation6], 1 }
 0xe85   :  { %1851 = vsyncpa [#allocation6 + $0x1], 1 }

</bundles_post_ra>
